<compile_context>
chip_gen: v7x
topology: tpu7x:2x2x1
jax: 0.10.0
libtpu: 0.0.40
codegen_flags: <defaults>
</compile_context>

<pallas_src>
import functools

import jax
import jax.numpy as jnp
from jax.experimental import pallas as pl
from jax.experimental.pallas import tpu as pltpu

# 48 MiB: safely below v7x's 64 MiB physical VMEM, well above the 32 MiB default
# on v5e/v6e so larger tiles are admitted there.
VMEM_LIMIT = 48 * 1024 * 1024


# ----------------------------- tiling helpers --------------------------------

def _tile(dim, preferred, align):
    """Largest multiple of `align` <= `preferred` dividing `dim`; else full dim."""
    if dim <= preferred:
        return dim
    t = (preferred // align) * align
    while t >= align:
        if dim % t == 0:
            return t
        t -= align
    return dim  # full-extent block is always legal


def _choose_head_block(heads, head_dim):
    """Smallest head count whose lane width (hb*hd) is 128-aligned (HD=128 typ.)."""
    for hb in range(1, heads + 1):
        if heads % hb == 0 and (hb * head_dim) % 128 == 0:
            return hb
    return None


# ----------------------------- Pallas kernels --------------------------------

def _matmul_kernel(x_ref, w_ref, b_ref, o_ref, acc_ref):
    """K-tiled matmul with f32 accumulator; bias epilogue."""
    @pl.when(pl.program_id(2) == 0)
    def _():
        acc_ref[...] = jnp.zeros_like(acc_ref)
    acc_ref[...] += jnp.dot(x_ref[...], w_ref[...],
                            preferred_element_type=jnp.float32)
    @pl.when(pl.program_id(2) == pl.num_programs(2) - 1)
    def _():
        o_ref[...] = (acc_ref[...] + b_ref[...]).astype(o_ref.dtype)


def _matmul_residual_kernel(x_ref, w_ref, b_ref, r_ref, o_ref, acc_ref):
    """K-tiled matmul; bias + residual-add fused into the epilogue."""
    @pl.when(pl.program_id(2) == 0)
    def _():
        acc_ref[...] = jnp.zeros_like(acc_ref)
    acc_ref[...] += jnp.dot(x_ref[...], w_ref[...],
                            preferred_element_type=jnp.float32)
    @pl.when(pl.program_id(2) == pl.num_programs(2) - 1)
    def _():
        y = acc_ref[...] + b_ref[...] + r_ref[...].astype(jnp.float32)
        o_ref[...] = y.astype(o_ref.dtype)


def _ln_linear_kernel(x_ref, g_ref, b_ref, w_ref, bias_ref, o_ref, xn_ref,
                      *, eps, gelu):
    """Fused LayerNorm prologue + matmul + bias (+ tanh GELU).

    The normalized rows are computed once per row block (j == 0) into a bf16
    VMEM scratch and reused for every output-column tile -> j > 0 steps are
    pure MXU streaming.
    """
    @pl.when(pl.program_id(1) == 0)
    def _():
        x = x_ref[...].astype(jnp.float32)
        mu = jnp.mean(x, axis=-1, keepdims=True)
        xc = x - mu
        var = jnp.mean(xc * xc, axis=-1, keepdims=True)
        xn = xc * jax.lax.rsqrt(var + eps) * g_ref[...] + b_ref[...]
        xn_ref[...] = xn.astype(xn_ref.dtype)
    y = jnp.dot(xn_ref[...], w_ref[...], preferred_element_type=jnp.float32)
    y = y + bias_ref[...]
    if gelu:
        # tanh approximation -> EUP slot (PyTorch nn.GELU default is exact erf;
        # approximate=False restores bit-level parity at VPU cost).
        y = jax.nn.gelu(y, approximate=True)
    o_ref[...] = y.astype(o_ref.dtype)


def _layernorm_kernel(x_ref, g_ref, b_ref, o_ref, *, eps):
    x = x_ref[...].astype(jnp.float32)
    mu = jnp.mean(x, axis=-1, keepdims=True)
    xc = x - mu
    var = jnp.mean(xc * xc, axis=-1, keepdims=True)
    inv = jax.lax.rsqrt(var + eps)
    o_ref[...] = (xc * inv * g_ref[...] + b_ref[...]).astype(o_ref.dtype)


def _attn_proj_kernel(q_ref, k_ref, v_ref, w_ref, b_ref, r_ref, o_ref, acc_ref,
                      *, heads_per_block, head_dim, n_valid):
    """Fused attention + head-merge + output projection + bias + residual.

    Grid: (batch, q_tile, head_block); head_block is the reduction axis.
      q ref: (1, tq, HD)      lane-offset slice of the qkv buffer (q heads)
      k/v  : (1, Npad, HD)    lane-offset slices of the qkv buffer
      w    : (1, HD, D)       matching rows of the projection weight
      r/o  : (1, tq, D)       residual in / projected output out
      acc  : (tq, D) f32      accumulated over head blocks

    1/sqrt(head_dim) is already folded into the q columns of qkv_w/qkv_b.
    """
    h = pl.program_id(2)

    @pl.when(h == 0)
    def _():
        acc_ref[...] = jnp.zeros_like(acc_ref)

    n_keys = k_ref.shape[1]
    outs = []
    for i in range(heads_per_block):
        sl = slice(i * head_dim, (i + 1) * head_dim)
        q = q_ref[0, :, sl]
        k = k_ref[0, :, sl]
        v = v_ref[0, :, sl]
        # bf16 MXU inputs, f32 scores; contract last dims (no k.T / XLU transpose).
        s = jax.lax.dot_general(q, k, (((1,), (1,)), ((), ())),
                                preferred_element_type=jnp.float32)
        if n_valid < n_keys:  # mask padded key columns (static at trace time)
            col = jax.lax.broadcasted_iota(jnp.int32, s.shape, 1)
            s = jnp.where(col < n_valid, s, -jnp.inf)
        m = jnp.max(s, axis=-1, keepdims=True)
        p = jnp.exp(s - m)
        denom = jnp.sum(p, axis=-1, keepdims=True)
        o = jnp.dot(p.astype(v.dtype), v, preferred_element_type=jnp.float32)
        # Normalize AFTER PV: (tq, hd) multiply instead of (tq, N); recip on EUP.
        outs.append(o * pl.reciprocal(denom, approx=True))

    attn_blk = outs[0] if len(outs) == 1 else jnp.concatenate(outs, axis=-1)
    acc_ref[...] += jnp.dot(attn_blk.astype(w_ref.dtype), w_ref[0],
                            preferred_element_type=jnp.float32)

    @pl.when(h == pl.num_programs(2) - 1)
    def _():
        y = acc_ref[...] + b_ref[...] + r_ref[0].astype(jnp.float32)
        o_ref[0] = y.astype(o_ref.dtype)


# ----------------------------- pallas_call wrappers ---------------------------

def pallas_matmul(x, w, b, residual=None, *, tm_pref=256, tn_pref=512,
                  tk_pref=1024):
    """x:(M,K) @ w:(K,N) + b  (+ residual), tiled over (M, N, K)."""
    M, K = x.shape
    N = w.shape[1]
    tm = _tile(M, tm_pref, 8)
    tn = _tile(N, tn_pref, 128)
    tk = _tile(K, tk_pref, 128)
    grid = (M // tm, N // tn, K // tk)
    in_specs = [
        pl.BlockSpec((tm, tk), lambda i, j, k: (i, k)),
        pl.BlockSpec((tk, tn), lambda i, j, k: (k, j)),
        pl.BlockSpec((1, tn), lambda i, j, k: (0, j)),
    ]
    args = [x, w, b.reshape(1, N)]
    if residual is not None:
        in_specs.append(pl.BlockSpec((tm, tn), lambda i, j, k: (i, j)))
        args.append(residual)
        kern = _matmul_residual_kernel
    else:
        kern = _matmul_kernel
    return pl.pallas_call(
        kern,
        out_shape=jax.ShapeDtypeStruct((M, N), x.dtype),
        grid=grid,
        in_specs=in_specs,
        out_specs=pl.BlockSpec((tm, tn), lambda i, j, k: (i, j)),
        scratch_shapes=[pltpu.VMEM((tm, tn), jnp.float32)],
        compiler_params=pltpu.CompilerParams(
            dimension_semantics=("parallel", "parallel", "arbitrary"),
            vmem_limit_bytes=VMEM_LIMIT),
    )(*args)


def pallas_ln_linear(x, gamma, beta, w, b, *, gelu=False, eps=1e-6,
                     tm_pref=128, tn_pref=512):
    """Fused LayerNorm(x) @ w + b (+GELU); LN rows cached in VMEM across j tiles."""
    M, K = x.shape
    N = w.shape[1]
    tm = _tile(M, tm_pref, 8)
    tn = _tile(N, tn_pref, 128)
    return pl.pallas_call(
        functools.partial(_ln_linear_kernel, eps=eps, gelu=gelu),
        out_shape=jax.ShapeDtypeStruct((M, N), x.dtype),
        grid=(M // tm, N // tn),
        in_specs=[
            pl.BlockSpec((tm, K), lambda i, j: (i, 0)),
            pl.BlockSpec((1, K), lambda i, j: (0, 0)),
            pl.BlockSpec((1, K), lambda i, j: (0, 0)),
            pl.BlockSpec((K, tn), lambda i, j: (0, j)),
            pl.BlockSpec((1, tn), lambda i, j: (0, j)),
        ],
        out_specs=pl.BlockSpec((tm, tn), lambda i, j: (i, j)),
        scratch_shapes=[pltpu.VMEM((tm, K), w.dtype)],
        compiler_params=pltpu.CompilerParams(
            # j axis must stay "arbitrary": the cached LN rows are produced at
            # j == 0 and consumed by the following j tiles of the same row block.
            dimension_semantics=("parallel", "arbitrary"),
            vmem_limit_bytes=VMEM_LIMIT),
    )(x, gamma.reshape(1, K), beta.reshape(1, K), w, b.reshape(1, N))


def pallas_layernorm(x, gamma, beta, *, eps=1e-6, out_dtype=None):
    M, D = x.shape
    tm = _tile(M, 256, 8)
    return pl.pallas_call(
        functools.partial(_layernorm_kernel, eps=eps),
        out_shape=jax.ShapeDtypeStruct((M, D), out_dtype or x.dtype),
        grid=(M // tm,),
        in_specs=[pl.BlockSpec((tm, D), lambda i: (i, 0)),
                  pl.BlockSpec((1, D), lambda i: (0, 0)),
                  pl.BlockSpec((1, D), lambda i: (0, 0))],
        out_specs=pl.BlockSpec((tm, D), lambda i: (i, 0)),
        compiler_params=pltpu.CompilerParams(
            dimension_semantics=("parallel",),
            vmem_limit_bytes=VMEM_LIMIT),
    )(x, gamma.reshape(1, D), beta.reshape(1, D))


def pallas_attention_proj(qkv, residual, proj_w, proj_b, *, heads, head_dim,
                          n_valid, tq_pref=256):
    """Fused MHSA + head-merge + output projection + residual.

    qkv:      (B, Npad, 3D) fused QKV activations (scale pre-folded into q cols)
    residual: (B, Npad, D)
    proj_w:   (D, D) head-ordered rows -> reshaped to (nhb, HD, D)
    Returns   (B, Npad, D): residual + attn_out @ proj_w + proj_b
    """
    B, Npad, threeD = qkv.shape
    D = heads * head_dim
    assert threeD == 3 * D
    hb = _choose_head_block(heads, head_dim)
    assert hb is not None, "embed_dim must be a multiple of 128 for head slicing"
    HD = hb * head_dim
    nhb = heads // hb
    tq = _tile(Npad, tq_pref, 8)
    nq = Npad // tq
    w_r = proj_w.reshape(nhb, HD, D)

    q_spec = pl.BlockSpec((1, tq, HD), lambda b, qi, h: (b, qi, h))
    k_spec = pl.BlockSpec((1, Npad, HD), lambda b, qi, h, off=nhb: (b, 0, off + h))
    v_spec = pl.BlockSpec((1, Npad, HD),
                          lambda b, qi, h, off=2 * nhb: (b, 0, off + h))
    return pl.pallas_call(
        functools.partial(_attn_proj_kernel, heads_per_block=hb,
                          head_dim=head_dim, n_valid=n_valid),
        out_shape=jax.ShapeDtypeStruct((B, Npad, D), residual.dtype),
        grid=(B, nq, nhb),
        in_specs=[
            q_spec, k_spec, v_spec,
            pl.BlockSpec((1, HD, D), lambda b, qi, h: (h, 0, 0)),
            pl.BlockSpec((1, D), lambda b, qi, h: (0, 0)),
            pl.BlockSpec((1, tq, D), lambda b, qi, h: (b, qi, 0)),
        ],
        out_specs=pl.BlockSpec((1, tq, D), lambda b, qi, h: (b, qi, 0)),
        scratch_shapes=[pltpu.VMEM((tq, D), jnp.float32)],
        compiler_params=pltpu.CompilerParams(
            dimension_semantics=("parallel", "parallel", "arbitrary"),
            vmem_limit_bytes=VMEM_LIMIT),
    )(qkv, qkv, qkv, w_r, proj_b.reshape(1, D), residual)


# ----------------------------- parameter init --------------------------------

def init_params(key, *, in_chans, img_size, patch, embed_dim, depth, heads,
                mlp_hidden):
    num_patches = (img_size // patch) ** 2
    head_dim = embed_dim // heads
    attn_scale = 1.0 / float(head_dim) ** 0.5
    ks = iter(jax.random.split(key, 8 + depth * 12))
    nrm = lambda shape: 0.02 * jax.random.normal(next(ks), shape, jnp.float32)
    bfw = lambda shape: nrm(shape).astype(jnp.bfloat16)   # bf16 MXU weights

    params = dict(
        patch=patch, embed_dim=embed_dim, heads=heads,
        # Conv2d(in_chans, embed_dim, kernel=stride=patch) as matmul:
        # weight flattened (C, ph, pw) -> stored (C*p*p, embed_dim).
        patch_w=bfw((in_chans * patch * patch, embed_dim)),
        patch_b=nrm((embed_dim,)),
        cls_token=nrm((1, 1, embed_dim)),
        pos_embed=nrm((1, num_patches + 1, embed_dim)),
        norm_g=jnp.ones((embed_dim,), jnp.float32),
        norm_b=jnp.zeros((embed_dim,), jnp.float32),
        blocks=[],
    )
    for _ in range(depth):
        # Fold 1/sqrt(head_dim) into the q columns of the QKV projection so the
        # attention kernel never multiplies by the scale at runtime.
        qkv_w = nrm((embed_dim, 3 * embed_dim))
        qkv_b = nrm((3 * embed_dim,))
        qkv_w = qkv_w.at[:, :embed_dim].multiply(attn_scale)
        qkv_b = qkv_b.at[:embed_dim].multiply(attn_scale)
        params["blocks"].append(dict(
            ln1_g=jnp.ones((embed_dim,), jnp.float32),
            ln1_b=jnp.zeros((embed_dim,), jnp.float32),
            qkv_w=qkv_w.astype(jnp.bfloat16),
            qkv_b=qkv_b,
            proj_w=bfw((embed_dim, embed_dim)),
            proj_b=nrm((embed_dim,)),
            ln2_g=jnp.ones((embed_dim,), jnp.float32),
            ln2_b=jnp.zeros((embed_dim,), jnp.float32),
            fc1_w=bfw((embed_dim, mlp_hidden)),
            fc1_b=nrm((mlp_hidden,)),
            fc2_w=bfw((mlp_hidden, embed_dim)),
            fc2_b=nrm((embed_dim,)),
        ))
    return params


# ----------------------------- forward pass ----------------------------------

def feature_extractor_forward(params, x):
    """x: NCHW image tensor -> (B, feature_dim) cls-token features."""
    B, C, H, W = x.shape
    p = params["patch"]
    D = params["embed_dim"]
    heads = params["heads"]
    hd = D // heads
    nH, nW = H // p, W // p

    # Patchify exactly as Conv2d(kernel=stride=p) sees the input (glue, one-time).
    patches = (x.reshape(B, C, nH, p, nW, p)
                .transpose(0, 2, 4, 1, 3, 5)
                .reshape(B * nH * nW, C * p * p)).astype(jnp.bfloat16)
    tok = pallas_matmul(patches, params["patch_w"], params["patch_b"])
    tok = tok.reshape(B, nH * nW, D)

    cls = jnp.broadcast_to(params["cls_token"], (B, 1, D))
    xseq = jnp.concatenate([cls, tok.astype(jnp.float32)], axis=1)
    xseq = xseq + params["pos_embed"]                              # (B, N, D) f32
    n_valid = xseq.shape[1]
    n_pad = (-n_valid) % 8                                         # 8-sublane pad
    if n_pad:
        xseq = jnp.pad(xseq, ((0, 0), (0, n_pad), (0, 0)))
    xseq = xseq.astype(jnp.bfloat16)                               # (B, Npad, D)
    Npad = n_valid + n_pad

    for blk in params["blocks"]:
        # --- attention: LN+QKV fused; attention+merge+proj+residual fused ---
        x2d = xseq.reshape(B * Npad, D)
        qkv = pallas_ln_linear(x2d, blk["ln1_g"], blk["ln1_b"],
                               blk["qkv_w"], blk["qkv_b"])         # (B*Npad, 3D)
        xseq = pallas_attention_proj(qkv.reshape(B, Npad, 3 * D), xseq,
                                     blk["proj_w"], blk["proj_b"],
                                     heads=heads, head_dim=hd, n_valid=n_valid)

        # --- MLP: LN+fc1+GELU fused, fc2+residual fused ---
        x2d = xseq.reshape(B * Npad, D)
        h1 = pallas_ln_linear(x2d, blk["ln2_g"], blk["ln2_b"],
                              blk["fc1_w"], blk["fc1_b"], gelu=True)
        xseq = pallas_matmul(h1, blk["fc2_w"], blk["fc2_b"],
                             residual=x2d).reshape(B, Npad, D)

    # Final LayerNorm is per-row; only the returned cls rows need normalizing.
    feats = pallas_layernorm(xseq[:, 0, :], params["norm_g"], params["norm_b"],
                             out_dtype=jnp.float32)
    return feats  # (B, feature_dim)


# ----------------------------- main -------------------------------------------

if __name__ == "__main__":
    key = jax.random.PRNGKey(0)
    k_param, k_x = jax.random.split(key)

    # Small but lane-friendly demo shapes (D multiple of 128).
    B, C, H, W = 2, 3, 32, 32
    PATCH, EMBED, DEPTH, HEADS, MLP = 8, 128, 2, 4, 256

    params = init_params(k_param, in_chans=C, img_size=H, patch=PATCH,
                         embed_dim=EMBED, depth=DEPTH, heads=HEADS,
                         mlp_hidden=MLP)
    x = jax.random.normal(k_x, (B, C, H, W), jnp.float32)

    fwd = jax.jit(lambda inp: feature_extractor_forward(params, inp))
    feats = jax.block_until_ready(fwd(x))
    assert feats.shape == (B, EMBED), feats.shape
    assert bool(jnp.all(jnp.isfinite(feats)))
    print("KERNEL_OK")
</pallas_src>

<mosaic_0001>
module attributes {stable_mosaic.version = 11 : i64} {
  func.func @_matmul_kernel(%arg0: i32, %arg1: i32, %arg2: i32, %arg3: memref<32x192xbf16, #tpu.memory_space<vmem>>, %arg4: memref<192x128xbf16, #tpu.memory_space<vmem>>, %arg5: memref<1x128xf32, #tpu.memory_space<vmem>>, %arg6: memref<32x128xbf16, #tpu.memory_space<vmem>>, %arg7: memref<32x128xf32, #tpu.memory_space<vmem>>) attributes {dimension_semantics = [#tpu.dimension_semantics<parallel>, #tpu.dimension_semantics<parallel>, #tpu.dimension_semantics<arbitrary>], iteration_bounds = array<i64: 1, 1, 1>, scalar_prefetch = 0 : i64, scratch_operands = 1 : i64, tpu.core_type = #tpu.core_type<tc>, window_params = [{transform_indices = @transform_0, window_bounds = array<i64: 32, 192>}, {transform_indices = @transform_1, window_bounds = array<i64: 192, 128>}, {transform_indices = @transform_2, window_bounds = array<i64: 1, 128>}, {transform_indices = @transform_3, window_bounds = array<i64: 32, 128>}]} {
    %c0_i32 = arith.constant 0 : i32
    %0 = arith.cmpi eq, %arg2, %c0_i32 : i32
    %1 = arith.extui %0 : i1 to i32
    %c0_i32_0 = arith.constant 0 : i32
    %2 = arith.cmpi ne, %1, %c0_i32_0 : i32
    scf.if %2 {
      %cst_10 = arith.constant 0.000000e+00 : f32
      %12 = vector.broadcast %cst_10 : f32 to vector<32x128xf32>
      %c0_11 = arith.constant 0 : index
      %c0_12 = arith.constant 0 : index
      %13 = vector.load %arg7[%c0_11, %c0_12] : memref<32x128xf32, #tpu.memory_space<vmem>>, vector<32x128xf32>
      tpu.vector_store %arg7[%c0_11, %c0_12], %12 {strides = array<i32>} : memref<32x128xf32, #tpu.memory_space<vmem>>, vector<32x128xf32>,
    } else {
    }
    %c0 = arith.constant 0 : index
    %c0_1 = arith.constant 0 : index
    %3 = vector.load %arg7[%c0, %c0_1] : memref<32x128xf32, #tpu.memory_space<vmem>>, vector<32x128xf32>
    %c0_2 = arith.constant 0 : index
    %c0_3 = arith.constant 0 : index
    %4 = vector.load %arg3[%c0_2, %c0_3] : memref<32x192xbf16, #tpu.memory_space<vmem>>, vector<32x192xbf16>
    %c0_4 = arith.constant 0 : index
    %c0_5 = arith.constant 0 : index
    %5 = vector.load %arg4[%c0_4, %c0_5] : memref<192x128xbf16, #tpu.memory_space<vmem>>, vector<192x128xbf16>
    %cst = arith.constant dense<0.000000e+00> : vector<32x128xf32>
    %6 = tpu.matmul %4, %5, %cst {dimension_numbers = #tpu.dot_dimension_numbers<[1], [0], [0], [1], [0, 0, 1, 1], [], []>} : vector<32x192xbf16>, vector<192x128xbf16>, vector<32x128xf32> -> vector<32x128xf32>
    %7 = arith.addf %3, %6 : vector<32x128xf32>
    %c0_6 = arith.constant 0 : index
    %c0_7 = arith.constant 0 : index
    %8 = vector.load %arg7[%c0_6, %c0_7] : memref<32x128xf32, #tpu.memory_space<vmem>>, vector<32x128xf32>
    tpu.vector_store %arg7[%c0_6, %c0_7], %7 {strides = array<i32>} : memref<32x128xf32, #tpu.memory_space<vmem>>, vector<32x128xf32>,
    %c0_i32_8 = arith.constant 0 : i32
    %9 = arith.cmpi eq, %arg2, %c0_i32_8 : i32
    %10 = arith.extui %9 : i1 to i32
    %c0_i32_9 = arith.constant 0 : i32
    %11 = arith.cmpi ne, %10, %c0_i32_9 : i32
    scf.if %11 {
      %c0_10 = arith.constant 0 : index
      %c0_11 = arith.constant 0 : index
      %12 = vector.load %arg7[%c0_10, %c0_11] : memref<32x128xf32, #tpu.memory_space<vmem>>, vector<32x128xf32>
      %c0_12 = arith.constant 0 : index
      %c0_13 = arith.constant 0 : index
      %13 = vector.load %arg5[%c0_12, %c0_13] : memref<1x128xf32, #tpu.memory_space<vmem>>, vector<1x128xf32>
      %14 = vector.broadcast %13 : vector<1x128xf32> to vector<32x128xf32>
      %15 = arith.addf %12, %14 : vector<32x128xf32>
      %16 = arith.truncf %15 : vector<32x128xf32> to vector<32x128xbf16>
      %c0_14 = arith.constant 0 : index
      %c0_15 = arith.constant 0 : index
      %17 = vector.load %arg6[%c0_14, %c0_15] : memref<32x128xbf16, #tpu.memory_space<vmem>>, vector<32x128xbf16>
      tpu.vector_store %arg6[%c0_14, %c0_15], %16 {strides = array<i32>} : memref<32x128xbf16, #tpu.memory_space<vmem>>, vector<32x128xbf16>,
    } else {
    }
    return
  }
  func.func @transform_0(%arg0: i32, %arg1: i32, %arg2: i32) -> (i32, i32) {
    %c0_i32 = arith.constant 0 : i32
    return %arg0, %arg2 : i32, i32
  }
  func.func @transform_1(%arg0: i32, %arg1: i32, %arg2: i32) -> (i32, i32) {
    %c0_i32 = arith.constant 0 : i32
    return %arg2, %arg1 : i32, i32
  }
  func.func @transform_2(%arg0: i32, %arg1: i32, %arg2: i32) -> (i32, i32) {
    %c0_i32 = arith.constant 0 : i32
    %c0_i32_0 = arith.constant 0 : i32
    return %c0_i32, %arg1 : i32, i32
  }
  func.func @transform_3(%arg0: i32, %arg1: i32, %arg2: i32) -> (i32, i32) {
    %c0_i32 = arith.constant 0 : i32
    return %arg0, %arg1 : i32, i32
  }
}

module attributes {stable_mosaic.version = 11 : i64} {
  func.func @_ln_linear_kernel(%arg0: i32, %arg1: i32, %arg2: memref<48x128xbf16, #tpu.memory_space<vmem>>, %arg3: memref<1x128xf32, #tpu.memory_space<vmem>>, %arg4: memref<1x128xf32, #tpu.memory_space<vmem>>, %arg5: memref<128x384xbf16, #tpu.memory_space<vmem>>, %arg6: memref<1x384xf32, #tpu.memory_space<vmem>>, %arg7: memref<48x384xbf16, #tpu.memory_space<vmem>>, %arg8: memref<48x128xbf16, #tpu.memory_space<vmem>>) attributes {dimension_semantics = [#tpu.dimension_semantics<parallel>, #tpu.dimension_semantics<arbitrary>], iteration_bounds = array<i64: 1, 1>, scalar_prefetch = 0 : i64, scratch_operands = 1 : i64, tpu.core_type = #tpu.core_type<tc>, window_params = [{transform_indices = @transform_0, window_bounds = array<i64: 48, 128>}, {pipeline_mode = #tpu.pipeline_mode<synchronous>, transform_indices = @transform_1, window_bounds = array<i64: 1, 128>}, {pipeline_mode = #tpu.pipeline_mode<synchronous>, transform_indices = @transform_2, window_bounds = array<i64: 1, 128>}, {transform_indices = @transform_3, window_bounds = array<i64: 128, 384>}, {transform_indices = @transform_4, window_bounds = array<i64: 1, 384>}, {transform_indices = @transform_5, window_bounds = array<i64: 48, 384>}]} {
    %c0_i32 = arith.constant 0 : i32
    %0 = arith.cmpi eq, %arg1, %c0_i32 : i32
    %1 = arith.extui %0 : i1 to i32
    %c0_i32_0 = arith.constant 0 : i32
    %2 = arith.cmpi ne, %1, %c0_i32_0 : i32
    scf.if %2 {
      %c0_8 = arith.constant 0 : index
      %c0_9 = arith.constant 0 : index
      %11 = vector.load %arg2[%c0_8, %c0_9] : memref<48x128xbf16, #tpu.memory_space<vmem>>, vector<48x128xbf16>
      %12 = arith.extf %11 : vector<48x128xbf16> to vector<48x128xf32>
      %cst_10 = arith.constant dense<0.000000e+00> : vector<48xf32>
      %13 = vector.multi_reduction <add>, %12, %cst_10 [1] : vector<48x128xf32> to vector<48xf32>
      %14 = vector.shape_cast %13 : vector<48xf32> to vector<48x1xf32>
      %cst_11 = arith.constant 1.280000e+02 : f32
      %15 = vector.broadcast %cst_11 : f32 to vector<48x1xf32>
      %16 = arith.divf %14, %15 : vector<48x1xf32>
      %17 = vector.broadcast %16 : vector<48x1xf32> to vector<48x128xf32>
      %18 = arith.subf %12, %17 : vector<48x128xf32>
      %19 = arith.mulf %18, %18 : vector<48x128xf32>
      %cst_12 = arith.constant dense<0.000000e+00> : vector<48xf32>
      %20 = vector.multi_reduction <add>, %19, %cst_12 [1] : vector<48x128xf32> to vector<48xf32>
      %21 = vector.shape_cast %20 : vector<48xf32> to vector<48x1xf32>
      %cst_13 = arith.constant 1.280000e+02 : f32
      %22 = vector.broadcast %cst_13 : f32 to vector<48x1xf32>
      %23 = arith.divf %21, %22 : vector<48x1xf32>
      %cst_14 = arith.constant 9.99999997E-7 : f32
      %24 = vector.broadcast %cst_14 : f32 to vector<48x1xf32>
      %25 = arith.addf %23, %24 : vector<48x1xf32>
      %26 = math.rsqrt %25 : vector<48x1xf32>
      %27 = vector.broadcast %26 : vector<48x1xf32> to vector<48x128xf32>
      %28 = arith.mulf %18, %27 : vector<48x128xf32>
      %c0_15 = arith.constant 0 : index
      %c0_16 = arith.constant 0 : index
      %29 = vector.load %arg3[%c0_15, %c0_16] : memref<1x128xf32, #tpu.memory_space<vmem>>, vector<1x128xf32>
      %30 = vector.broadcast %29 : vector<1x128xf32> to vector<48x128xf32>
      %31 = arith.mulf %28, %30 : vector<48x128xf32>
      %c0_17 = arith.constant 0 : index
      %c0_18 = arith.constant 0 : index
      %32 = vector.load %arg4[%c0_17, %c0_18] : memref<1x128xf32, #tpu.memory_space<vmem>>, vector<1x128xf32>
      %33 = vector.broadcast %32 : vector<1x128xf32> to vector<48x128xf32>
      %34 = arith.addf %31, %33 : vector<48x128xf32>
      %35 = arith.truncf %34 : vector<48x128xf32> to vector<48x128xbf16>
      %c0_19 = arith.constant 0 : index
      %c0_20 = arith.constant 0 : index
      %36 = vector.load %arg8[%c0_19, %c0_20] : memref<48x128xbf16, #tpu.memory_space<vmem>>, vector<48x128xbf16>
      tpu.vector_store %arg8[%c0_19, %c0_20], %35 {strides = array<i32>} : memref<48x128xbf16, #tpu.memory_space<vmem>>, vector<48x128xbf16>,
    } else {
    }
    %c0 = arith.constant 0 : index
    %c0_1 = arith.constant 0 : index
    %3 = vector.load %arg8[%c0, %c0_1] : memref<48x128xbf16, #tpu.memory_space<vmem>>, vector<48x128xbf16>
    %c0_2 = arith.constant 0 : index
    %c0_3 = arith.constant 0 : index
    %4 = vector.load %arg5[%c0_2, %c0_3] : memref<128x384xbf16, #tpu.memory_space<vmem>>, vector<128x384xbf16>
    %cst = arith.constant dense<0.000000e+00> : vector<48x384xf32>
    %5 = tpu.matmul %3, %4, %cst {dimension_numbers = #tpu.dot_dimension_numbers<[1], [0], [0], [1], [0, 0, 1, 1], [], []>} : vector<48x128xbf16>, vector<128x384xbf16>, vector<48x384xf32> -> vector<48x384xf32>
    %c0_4 = arith.constant 0 : index
    %c0_5 = arith.constant 0 : index
    %6 = vector.load %arg6[%c0_4, %c0_5] : memref<1x384xf32, #tpu.memory_space<vmem>>, vector<1x384xf32>
    %7 = vector.broadcast %6 : vector<1x384xf32> to vector<48x384xf32>
    %8 = arith.addf %5, %7 : vector<48x384xf32>
    %9 = arith.truncf %8 : vector<48x384xf32> to vector<48x384xbf16>
    %c0_6 = arith.constant 0 : index
    %c0_7 = arith.constant 0 : index
    %10 = vector.load %arg7[%c0_6, %c0_7] : memref<48x384xbf16, #tpu.memory_space<vmem>>, vector<48x384xbf16>
    tpu.vector_store %arg7[%c0_6, %c0_7], %9 {strides = array<i32>} : memref<48x384xbf16, #tpu.memory_space<vmem>>, vector<48x384xbf16>,
    return
  }
  func.func @transform_0(%arg0: i32, %arg1: i32) -> (i32, i32) {
    %c0_i32 = arith.constant 0 : i32
    %c0_i32_0 = arith.constant 0 : i32
    return %arg0, %c0_i32 : i32, i32
  }
  func.func @transform_1(%arg0: i32, %arg1: i32) -> (i32, i32) {
    %c0_i32 = arith.constant 0 : i32
    %c0_i32_0 = arith.constant 0 : i32
    %c0_i32_1 = arith.constant 0 : i32
    return %c0_i32, %c0_i32_0 : i32, i32
  }
  func.func @transform_2(%arg0: i32, %arg1: i32) -> (i32, i32) {
    %c0_i32 = arith.constant 0 : i32
    %c0_i32_0 = arith.constant 0 : i32
    %c0_i32_1 = arith.constant 0 : i32
    return %c0_i32, %c0_i32_0 : i32, i32
  }
  func.func @transform_3(%arg0: i32, %arg1: i32) -> (i32, i32) {
    %c0_i32 = arith.constant 0 : i32
    %c0_i32_0 = arith.constant 0 : i32
    return %c0_i32, %arg1 : i32, i32
  }
  func.func @transform_4(%arg0: i32, %arg1: i32) -> (i32, i32) {
    %c0_i32 = arith.constant 0 : i32
    %c0_i32_0 = arith.constant 0 : i32
    return %c0_i32, %arg1 : i32, i32
  }
  func.func @transform_5(%arg0: i32, %arg1: i32) -> (i32, i32) {
    %c0_i32 = arith.constant 0 : i32
    return %arg0, %arg1 : i32, i32
  }
}

module attributes {stable_mosaic.version = 11 : i64} {
  func.func @_attn_proj_kernel(%arg0: i32, %arg1: i32, %arg2: i32, %arg3: memref<1x24x128xbf16, #tpu.memory_space<vmem>>, %arg4: memref<1x24x128xbf16, #tpu.memory_space<vmem>>, %arg5: memref<1x24x128xbf16, #tpu.memory_space<vmem>>, %arg6: memref<1x128x128xbf16, #tpu.memory_space<vmem>>, %arg7: memref<1x128xf32, #tpu.memory_space<vmem>>, %arg8: memref<1x24x128xbf16, #tpu.memory_space<vmem>>, %arg9: memref<1x24x128xbf16, #tpu.memory_space<vmem>>, %arg10: memref<24x128xf32, #tpu.memory_space<vmem>>) attributes {dimension_semantics = [#tpu.dimension_semantics<parallel>, #tpu.dimension_semantics<parallel>, #tpu.dimension_semantics<arbitrary>], iteration_bounds = array<i64: 2, 1, 1>, scalar_prefetch = 0 : i64, scratch_operands = 1 : i64, tpu.core_type = #tpu.core_type<tc>, window_params = [{transform_indices = @transform_0, window_bounds = array<i64: 1, 24, 128>}, {transform_indices = @transform_1, window_bounds = array<i64: 1, 24, 128>}, {transform_indices = @transform_2, window_bounds = array<i64: 1, 24, 128>}, {transform_indices = @transform_3, window_bounds = array<i64: 1, 128, 128>}, {pipeline_mode = #tpu.pipeline_mode<synchronous>, transform_indices = @transform_4, window_bounds = array<i64: 1, 128>}, {transform_indices = @transform_5, window_bounds = array<i64: 1, 24, 128>}, {transform_indices = @transform_6, window_bounds = array<i64: 1, 24, 128>}]} {
    %c0_i32 = arith.constant 0 : i32
    %0 = arith.cmpi eq, %arg2, %c0_i32 : i32
    %1 = arith.extui %0 : i1 to i32
    %c0_i32_0 = arith.constant 0 : i32
    %2 = arith.cmpi ne, %1, %c0_i32_0 : i32
    scf.if %2 {
      %cst_65 = arith.constant 0.000000e+00 : f32
      %110 = vector.broadcast %cst_65 : f32 to vector<24x128xf32>
      %c0_66 = arith.constant 0 : index
      %c0_67 = arith.constant 0 : index
      %111 = vector.load %arg10[%c0_66, %c0_67] : memref<24x128xf32, #tpu.memory_space<vmem>>, vector<24x128xf32>
      tpu.vector_store %arg10[%c0_66, %c0_67], %110 {strides = array<i32>} : memref<24x128xf32, #tpu.memory_space<vmem>>, vector<24x128xf32>,
    } else {
    }
    %c0 = arith.constant 0 : index
    %c0_1 = arith.constant 0 : index
    %c0_2 = arith.constant 0 : index
    %3 = vector.load %arg3[%c0, %c0_1, %c0_2] : memref<1x24x128xbf16, #tpu.memory_space<vmem>>, vector<1x24x32xbf16>
    %4 = vector.shape_cast %3 : vector<1x24x32xbf16> to vector<24x32xbf16>
    %c0_3 = arith.constant 0 : index
    %c0_4 = arith.constant 0 : index
    %c0_5 = arith.constant 0 : index
    %5 = vector.load %arg4[%c0_3, %c0_4, %c0_5] : memref<1x24x128xbf16, #tpu.memory_space<vmem>>, vector<1x24x32xbf16>
    %6 = vector.shape_cast %5 : vector<1x24x32xbf16> to vector<24x32xbf16>
    %c0_6 = arith.constant 0 : index
    %c0_7 = arith.constant 0 : index
    %c0_8 = arith.constant 0 : index
    %7 = vector.load %arg5[%c0_6, %c0_7, %c0_8] : memref<1x24x128xbf16, #tpu.memory_space<vmem>>, vector<1x24x32xbf16>
    %8 = vector.shape_cast %7 : vector<1x24x32xbf16> to vector<24x32xbf16>
    %cst = arith.constant dense<0.000000e+00> : vector<24x24xf32>
    %9 = tpu.matmul %4, %6, %cst {dimension_numbers = #tpu.dot_dimension_numbers<[1], [1], [0], [0], [0, 0, 1, 0], [], []>} : vector<24x32xbf16>, vector<24x32xbf16>, vector<24x24xf32> -> vector<24x24xf32>
    %10 = tpu.iota {dimensions = array<i32: 1>} : vector<24x24xi32>
    %c17_i32 = arith.constant 17 : i32
    %11 = vector.broadcast %c17_i32 : i32 to vector<24x24xi32>
    %12 = arith.cmpi slt, %10, %11 : vector<24x24xi32>
    %cst_9 = arith.constant 0xFF800000 : f32
    %13 = vector.broadcast %cst_9 : f32 to vector<24x24xf32>
    %14 = arith.select %12, %9, %13 : vector<24x24xi1>, vector<24x24xf32>
    %cst_10 = arith.constant dense<0xFF800000> : vector<24xf32>
    %15 = vector.multi_reduction <maximumf>, %14, %cst_10 [1] : vector<24x24xf32> to vector<24xf32>
    %16 = vector.shape_cast %15 : vector<24xf32> to vector<24x1xf32>
    %17 = vector.broadcast %16 : vector<24x1xf32> to vector<24x24xf32>
    %18 = arith.subf %14, %17 : vector<24x24xf32>
    %19 = math.exp %18 : vector<24x24xf32>
    %cst_11 = arith.constant dense<0.000000e+00> : vector<24xf32>
    %20 = vector.multi_reduction <add>, %19, %cst_11 [1] : vector<24x24xf32> to vector<24xf32>
    %21 = vector.shape_cast %20 : vector<24xf32> to vector<24x1xf32>
    %22 = arith.truncf %19 : vector<24x24xf32> to vector<24x24xbf16>
    %cst_12 = arith.constant dense<0.000000e+00> : vector<24x32xf32>
    %23 = tpu.matmul %22, %8, %cst_12 {dimension_numbers = #tpu.dot_dimension_numbers<[1], [0], [0], [1], [0, 0, 1, 1], [], []>} : vector<24x24xbf16>, vector<24x32xbf16>, vector<24x32xf32> -> vector<24x32xf32>
    %24 = tpu.reciprocal %21 {approx = true} : vector<24x1xf32> -> vector<24x1xf32>
    %25 = vector.broadcast %24 : vector<24x1xf32> to vector<24x32xf32>
    %26 = arith.mulf %23, %25 : vector<24x32xf32>
    %c0_13 = arith.constant 0 : index
    %c0_14 = arith.constant 0 : index
    %c32 = arith.constant 32 : index
    %27 = vector.load %arg3[%c0_13, %c0_14, %c32] : memref<1x24x128xbf16, #tpu.memory_space<vmem>>, vector<1x24x32xbf16>
    %28 = vector.shape_cast %27 : vector<1x24x32xbf16> to vector<24x32xbf16>
    %c0_15 = arith.constant 0 : index
    %c0_16 = arith.constant 0 : index
    %c32_17 = arith.constant 32 : index
    %29 = vector.load %arg4[%c0_15, %c0_16, %c32_17] : memref<1x24x128xbf16, #tpu.memory_space<vmem>>, vector<1x24x32xbf16>
    %30 = vector.shape_cast %29 : vector<1x24x32xbf16> to vector<24x32xbf16>
    %c0_18 = arith.constant 0 : index
    %c0_19 = arith.constant 0 : index
    %c32_20 = arith.constant 32 : index
    %31 = vector.load %arg5[%c0_18, %c0_19, %c32_20] : memref<1x24x128xbf16, #tpu.memory_space<vmem>>, vector<1x24x32xbf16>
    %32 = vector.shape_cast %31 : vector<1x24x32xbf16> to vector<24x32xbf16>
    %cst_21 = arith.constant dense<0.000000e+00> : vector<24x24xf32>
    %33 = tpu.matmul %28, %30, %cst_21 {dimension_numbers = #tpu.dot_dimension_numbers<[1], [1], [0], [0], [0, 0, 1, 0], [], []>} : vector<24x32xbf16>, vector<24x32xbf16>, vector<24x24xf32> -> vector<24x24xf32>
    %34 = tpu.iota {dimensions = array<i32: 1>} : vector<24x24xi32>
    %c17_i32_22 = arith.constant 17 : i32
    %35 = vector.broadcast %c17_i32_22 : i32 to vector<24x24xi32>
    %36 = arith.cmpi slt, %34, %35 : vector<24x24xi32>
    %cst_23 = arith.constant 0xFF800000 : f32
    %37 = vector.broadcast %cst_23 : f32 to vector<24x24xf32>
    %38 = arith.select %36, %33, %37 : vector<24x24xi1>, vector<24x24xf32>
    %cst_24 = arith.constant dense<0xFF800000> : vector<24xf32>
    %39 = vector.multi_reduction <maximumf>, %38, %cst_24 [1] : vector<24x24xf32> to vector<24xf32>
    %40 = vector.shape_cast %39 : vector<24xf32> to vector<24x1xf32>
    %41 = vector.broadcast %40 : vector<24x1xf32> to vector<24x24xf32>
    %42 = arith.subf %38, %41 : vector<24x24xf32>
    %43 = math.exp %42 : vector<24x24xf32>
    %cst_25 = arith.constant dense<0.000000e+00> : vector<24xf32>
    %44 = vector.multi_reduction <add>, %43, %cst_25 [1] : vector<24x24xf32> to vector<24xf32>
    %45 = vector.shape_cast %44 : vector<24xf32> to vector<24x1xf32>
    %46 = arith.truncf %43 : vector<24x24xf32> to vector<24x24xbf16>
    %cst_26 = arith.constant dense<0.000000e+00> : vector<24x32xf32>
    %47 = tpu.matmul %46, %32, %cst_26 {dimension_numbers = #tpu.dot_dimension_numbers<[1], [0], [0], [1], [0, 0, 1, 1], [], []>} : vector<24x24xbf16>, vector<24x32xbf16>, vector<24x32xf32> -> vector<24x32xf32>
    %48 = tpu.reciprocal %45 {approx = true} : vector<24x1xf32> -> vector<24x1xf32>
    %49 = vector.broadcast %48 : vector<24x1xf32> to vector<24x32xf32>
    %50 = arith.mulf %47, %49 : vector<24x32xf32>
    %c0_27 = arith.constant 0 : index
    %c0_28 = arith.constant 0 : index
    %c64 = arith.constant 64 : index
    %51 = vector.load %arg3[%c0_27, %c0_28, %c64] : memref<1x24x128xbf16, #tpu.memory_space<vmem>>, vector<1x24x32xbf16>
    %52 = vector.shape_cast %51 : vector<1x24x32xbf16> to vector<24x32xbf16>
    %c0_29 = arith.constant 0 : index
    %c0_30 = arith.constant 0 : index
    %c64_31 = arith.constant 64 : index
    %53 = vector.load %arg4[%c0_29, %c0_30, %c64_31] : memref<1x24x128xbf16, #tpu.memory_space<vmem>>, vector<1x24x32xbf16>
    %54 = vector.shape_cast %53 : vector<1x24x32xbf16> to vector<24x32xbf16>
    %c0_32 = arith.constant 0 : index
    %c0_33 = arith.constant 0 : index
    %c64_34 = arith.constant 64 : index
    %55 = vector.load %arg5[%c0_32, %c0_33, %c64_34] : memref<1x24x128xbf16, #tpu.memory_space<vmem>>, vector<1x24x32xbf16>
    %56 = vector.shape_cast %55 : vector<1x24x32xbf16> to vector<24x32xbf16>
    %cst_35 = arith.constant dense<0.000000e+00> : vector<24x24xf32>
    %57 = tpu.matmul %52, %54, %cst_35 {dimension_numbers = #tpu.dot_dimension_numbers<[1], [1], [0], [0], [0, 0, 1, 0], [], []>} : vector<24x32xbf16>, vector<24x32xbf16>, vector<24x24xf32> -> vector<24x24xf32>
    %58 = tpu.iota {dimensions = array<i32: 1>} : vector<24x24xi32>
    %c17_i32_36 = arith.constant 17 : i32
    %59 = vector.broadcast %c17_i32_36 : i32 to vector<24x24xi32>
    %60 = arith.cmpi slt, %58, %59 : vector<24x24xi32>
    %cst_37 = arith.constant 0xFF800000 : f32
    %61 = vector.broadcast %cst_37 : f32 to vector<24x24xf32>
    %62 = arith.select %60, %57, %61 : vector<24x24xi1>, vector<24x24xf32>
    %cst_38 = arith.constant dense<0xFF800000> : vector<24xf32>
    %63 = vector.multi_reduction <maximumf>, %62, %cst_38 [1] : vector<24x24xf32> to vector<24xf32>
    %64 = vector.shape_cast %63 : vector<24xf32> to vector<24x1xf32>
    %65 = vector.broadcast %64 : vector<24x1xf32> to vector<24x24xf32>
    %66 = arith.subf %62, %65 : vector<24x24xf32>
    %67 = math.exp %66 : vector<24x24xf32>
    %cst_39 = arith.constant dense<0.000000e+00> : vector<24xf32>
    %68 = vector.multi_reduction <add>, %67, %cst_39 [1] : vector<24x24xf32> to vector<24xf32>
    %69 = vector.shape_cast %68 : vector<24xf32> to vector<24x1xf32>
    %70 = arith.truncf %67 : vector<24x24xf32> to vector<24x24xbf16>
    %cst_40 = arith.constant dense<0.000000e+00> : vector<24x32xf32>
    %71 = tpu.matmul %70, %56, %cst_40 {dimension_numbers = #tpu.dot_dimension_numbers<[1], [0], [0], [1], [0, 0, 1, 1], [], []>} : vector<24x24xbf16>, vector<24x32xbf16>, vector<24x32xf32> -> vector<24x32xf32>
    %72 = tpu.reciprocal %69 {approx = true} : vector<24x1xf32> -> vector<24x1xf32>
    %73 = vector.broadcast %72 : vector<24x1xf32> to vector<24x32xf32>
    %74 = arith.mulf %71, %73 : vector<24x32xf32>
    %c0_41 = arith.constant 0 : index
    %c0_42 = arith.constant 0 : index
    %c96 = arith.constant 96 : index
    %75 = vector.load %arg3[%c0_41, %c0_42, %c96] : memref<1x24x128xbf16, #tpu.memory_space<vmem>>, vector<1x24x32xbf16>
    %76 = vector.shape_cast %75 : vector<1x24x32xbf16> to vector<24x32xbf16>
    %c0_43 = arith.constant 0 : index
    %c0_44 = arith.constant 0 : index
    %c96_45 = arith.constant 96 : index
    %77 = vector.load %arg4[%c0_43, %c0_44, %c96_45] : memref<1x24x128xbf16, #tpu.memory_space<vmem>>, vector<1x24x32xbf16>
    %78 = vector.shape_cast %77 : vector<1x24x32xbf16> to vector<24x32xbf16>
    %c0_46 = arith.constant 0 : index
    %c0_47 = arith.constant 0 : index
    %c96_48 = arith.constant 96 : index
    %79 = vector.load %arg5[%c0_46, %c0_47, %c96_48] : memref<1x24x128xbf16, #tpu.memory_space<vmem>>, vector<1x24x32xbf16>
    %80 = vector.shape_cast %79 : vector<1x24x32xbf16> to vector<24x32xbf16>
    %cst_49 = arith.constant dense<0.000000e+00> : vector<24x24xf32>
    %81 = tpu.matmul %76, %78, %cst_49 {dimension_numbers = #tpu.dot_dimension_numbers<[1], [1], [0], [0], [0, 0, 1, 0], [], []>} : vector<24x32xbf16>, vector<24x32xbf16>, vector<24x24xf32> -> vector<24x24xf32>
    %82 = tpu.iota {dimensions = array<i32: 1>} : vector<24x24xi32>
    %c17_i32_50 = arith.constant 17 : i32
    %83 = vector.broadcast %c17_i32_50 : i32 to vector<24x24xi32>
    %84 = arith.cmpi slt, %82, %83 : vector<24x24xi32>
    %cst_51 = arith.constant 0xFF800000 : f32
    %85 = vector.broadcast %cst_51 : f32 to vector<24x24xf32>
    %86 = arith.select %84, %81, %85 : vector<24x24xi1>, vector<24x24xf32>
    %cst_52 = arith.constant dense<0xFF800000> : vector<24xf32>
    %87 = vector.multi_reduction <maximumf>, %86, %cst_52 [1] : vector<24x24xf32> to vector<24xf32>
    %88 = vector.shape_cast %87 : vector<24xf32> to vector<24x1xf32>
    %89 = vector.broadcast %88 : vector<24x1xf32> to vector<24x24xf32>
    %90 = arith.subf %86, %89 : vector<24x24xf32>
    %91 = math.exp %90 : vector<24x24xf32>
    %cst_53 = arith.constant dense<0.000000e+00> : vector<24xf32>
    %92 = vector.multi_reduction <add>, %91, %cst_53 [1] : vector<24x24xf32> to vector<24xf32>
    %93 = vector.shape_cast %92 : vector<24xf32> to vector<24x1xf32>
    %94 = arith.truncf %91 : vector<24x24xf32> to vector<24x24xbf16>
    %cst_54 = arith.constant dense<0.000000e+00> : vector<24x32xf32>
    %95 = tpu.matmul %94, %80, %cst_54 {dimension_numbers = #tpu.dot_dimension_numbers<[1], [0], [0], [1], [0, 0, 1, 1], [], []>} : vector<24x24xbf16>, vector<24x32xbf16>, vector<24x32xf32> -> vector<24x32xf32>
    %96 = tpu.reciprocal %93 {approx = true} : vector<24x1xf32> -> vector<24x1xf32>
    %97 = vector.broadcast %96 : vector<24x1xf32> to vector<24x32xf32>
    %98 = arith.mulf %95, %97 : vector<24x32xf32>
    %99 = tpu.concatenate %26, %50, %74, %98 in 1 : vector<24x32xf32>, vector<24x32xf32>, vector<24x32xf32>, vector<24x32xf32> -> vector<24x128xf32>
    %c0_55 = arith.constant 0 : index
    %c0_56 = arith.constant 0 : index
    %100 = vector.load %arg10[%c0_55, %c0_56] : memref<24x128xf32, #tpu.memory_space<vmem>>, vector<24x128xf32>
    %101 = arith.truncf %99 : vector<24x128xf32> to vector<24x128xbf16>
    %c0_57 = arith.constant 0 : index
    %c0_58 = arith.constant 0 : index
    %c0_59 = arith.constant 0 : index
    %102 = vector.load %arg6[%c0_57, %c0_58, %c0_59] : memref<1x128x128xbf16, #tpu.memory_space<vmem>>, vector<1x128x128xbf16>
    %103 = vector.shape_cast %102 : vector<1x128x128xbf16> to vector<128x128xbf16>
    %cst_60 = arith.constant dense<0.000000e+00> : vector<24x128xf32>
    %104 = tpu.matmul %101, %103, %cst_60 {dimension_numbers = #tpu.dot_dimension_numbers<[1], [0], [0], [1], [0, 0, 1, 1], [], []>} : vector<24x128xbf16>, vector<128x128xbf16>, vector<24x128xf32> -> vector<24x128xf32>
    %105 = arith.addf %100, %104 : vector<24x128xf32>
    %c0_61 = arith.constant 0 : index
    %c0_62 = arith.constant 0 : index
    %106 = vector.load %arg10[%c0_61, %c0_62] : memref<24x128xf32, #tpu.memory_space<vmem>>, vector<24x128xf32>
    tpu.vector_store %arg10[%c0_61, %c0_62], %105 {strides = array<i32>} : memref<24x128xf32, #tpu.memory_space<vmem>>, vector<24x128xf32>,
    %c0_i32_63 = arith.constant 0 : i32
    %107 = arith.cmpi eq, %arg2, %c0_i32_63 : i32
    %108 = arith.extui %107 : i1 to i32
    %c0_i32_64 = arith.constant 0 : i32
    %109 = arith.cmpi ne, %108, %c0_i32_64 : i32
    scf.if %109 {
      %c0_65 = arith.constant 0 : index
      %c0_66 = arith.constant 0 : index
      %110 = vector.load %arg10[%c0_65, %c0_66] : memref<24x128xf32, #tpu.memory_space<vmem>>, vector<24x128xf32>
      %c0_67 = arith.constant 0 : index
      %c0_68 = arith.constant 0 : index
      %111 = vector.load %arg7[%c0_67, %c0_68] : memref<1x128xf32, #tpu.memory_space<vmem>>, vector<1x128xf32>
      %112 = vector.broadcast %111 : vector<1x128xf32> to vector<24x128xf32>
      %113 = arith.addf %110, %112 : vector<24x128xf32>
      %c0_69 = arith.constant 0 : index
      %c0_70 = arith.constant 0 : index
      %c0_71 = arith.constant 0 : index
      %114 = vector.load %arg8[%c0_69, %c0_70, %c0_71] : memref<1x24x128xbf16, #tpu.memory_space<vmem>>, vector<1x24x128xbf16>
      %115 = vector.shape_cast %114 : vector<1x24x128xbf16> to vector<24x128xbf16>
      %116 = arith.extf %115 : vector<24x128xbf16> to vector<24x128xf32>
      %117 = arith.addf %113, %116 : vector<24x128xf32>
      %118 = arith.truncf %117 : vector<24x128xf32> to vector<24x128xbf16>
      %c0_72 = arith.constant 0 : index
      %c0_73 = arith.constant 0 : index
      %c0_74 = arith.constant 0 : index
      %119 = vector.load %arg9[%c0_72, %c0_73, %c0_74] : memref<1x24x128xbf16, #tpu.memory_space<vmem>>, vector<1x24x128xbf16>
      %120 = vector.shape_cast %119 : vector<1x24x128xbf16> to vector<24x128xbf16>
      %121 = vector.shape_cast %118 : vector<24x128xbf16> to vector<1x24x128xbf16>
      tpu.vector_store %arg9[%c0_72, %c0_73, %c0_74], %121 {strides = array<i32>} : memref<1x24x128xbf16, #tpu.memory_space<vmem>>, vector<1x24x128xbf16>,
    } else {
    }
    return
  }
  func.func @transform_0(%arg0: i32, %arg1: i32, %arg2: i32) -> (i32, i32, i32) {
    %c0_i32 = arith.constant 0 : i32
    return %arg0, %arg1, %arg2 : i32, i32, i32
  }
  func.func @transform_1(%arg0: i32, %arg1: i32, %arg2: i32) -> (i32, i32, i32) {
    %c1_i32 = arith.constant 1 : i32
    %0 = arith.addi %c1_i32, %arg2 : i32
    %c0_i32 = arith.constant 0 : i32
    %c0_i32_0 = arith.constant 0 : i32
    return %arg0, %c0_i32, %0 : i32, i32, i32
  }
  func.func @transform_2(%arg0: i32, %arg1: i32, %arg2: i32) -> (i32, i32, i32) {
    %c2_i32 = arith.constant 2 : i32
    %0 = arith.addi %c2_i32, %arg2 : i32
    %c0_i32 = arith.constant 0 : i32
    %c0_i32_0 = arith.constant 0 : i32
    return %arg0, %c0_i32, %0 : i32, i32, i32
  }
  func.func @transform_3(%arg0: i32, %arg1: i32, %arg2: i32) -> (i32, i32, i32) {
    %c0_i32 = arith.constant 0 : i32
    %c0_i32_0 = arith.constant 0 : i32
    %c0_i32_1 = arith.constant 0 : i32
    return %arg2, %c0_i32, %c0_i32_0 : i32, i32, i32
  }
  func.func @transform_4(%arg0: i32, %arg1: i32, %arg2: i32) -> (i32, i32) {
    %c0_i32 = arith.constant 0 : i32
    %c0_i32_0 = arith.constant 0 : i32
    %c0_i32_1 = arith.constant 0 : i32
    return %c0_i32, %c0_i32_0 : i32, i32
  }
  func.func @transform_5(%arg0: i32, %arg1: i32, %arg2: i32) -> (i32, i32, i32) {
    %c0_i32 = arith.constant 0 : i32
    %c0_i32_0 = arith.constant 0 : i32
    return %arg0, %arg1, %c0_i32 : i32, i32, i32
  }
  func.func @transform_6(%arg0: i32, %arg1: i32, %arg2: i32) -> (i32, i32, i32) {
    %c0_i32 = arith.constant 0 : i32
    %c0_i32_0 = arith.constant 0 : i32
    return %arg0, %arg1, %c0_i32 : i32, i32, i32
  }
}

module attributes {stable_mosaic.version = 11 : i64} {
  func.func @_ln_linear_kernel(%arg0: i32, %arg1: i32, %arg2: memref<48x128xbf16, #tpu.memory_space<vmem>>, %arg3: memref<1x128xf32, #tpu.memory_space<vmem>>, %arg4: memref<1x128xf32, #tpu.memory_space<vmem>>, %arg5: memref<128x256xbf16, #tpu.memory_space<vmem>>, %arg6: memref<1x256xf32, #tpu.memory_space<vmem>>, %arg7: memref<48x256xbf16, #tpu.memory_space<vmem>>, %arg8: memref<48x128xbf16, #tpu.memory_space<vmem>>) attributes {dimension_semantics = [#tpu.dimension_semantics<parallel>, #tpu.dimension_semantics<arbitrary>], iteration_bounds = array<i64: 1, 1>, scalar_prefetch = 0 : i64, scratch_operands = 1 : i64, tpu.core_type = #tpu.core_type<tc>, window_params = [{transform_indices = @transform_0, window_bounds = array<i64: 48, 128>}, {pipeline_mode = #tpu.pipeline_mode<synchronous>, transform_indices = @transform_1, window_bounds = array<i64: 1, 128>}, {pipeline_mode = #tpu.pipeline_mode<synchronous>, transform_indices = @transform_2, window_bounds = array<i64: 1, 128>}, {transform_indices = @transform_3, window_bounds = array<i64: 128, 256>}, {transform_indices = @transform_4, window_bounds = array<i64: 1, 256>}, {transform_indices = @transform_5, window_bounds = array<i64: 48, 256>}]} {
    %c0_i32 = arith.constant 0 : i32
    %0 = arith.cmpi eq, %arg1, %c0_i32 : i32
    %1 = arith.extui %0 : i1 to i32
    %c0_i32_0 = arith.constant 0 : i32
    %2 = arith.cmpi ne, %1, %c0_i32_0 : i32
    scf.if %2 {
      %c0_12 = arith.constant 0 : index
      %c0_13 = arith.constant 0 : index
      %24 = vector.load %arg2[%c0_12, %c0_13] : memref<48x128xbf16, #tpu.memory_space<vmem>>, vector<48x128xbf16>
      %25 = arith.extf %24 : vector<48x128xbf16> to vector<48x128xf32>
      %cst_14 = arith.constant dense<0.000000e+00> : vector<48xf32>
      %26 = vector.multi_reduction <add>, %25, %cst_14 [1] : vector<48x128xf32> to vector<48xf32>
      %27 = vector.shape_cast %26 : vector<48xf32> to vector<48x1xf32>
      %cst_15 = arith.constant 1.280000e+02 : f32
      %28 = vector.broadcast %cst_15 : f32 to vector<48x1xf32>
      %29 = arith.divf %27, %28 : vector<48x1xf32>
      %30 = vector.broadcast %29 : vector<48x1xf32> to vector<48x128xf32>
      %31 = arith.subf %25, %30 : vector<48x128xf32>
      %32 = arith.mulf %31, %31 : vector<48x128xf32>
      %cst_16 = arith.constant dense<0.000000e+00> : vector<48xf32>
      %33 = vector.multi_reduction <add>, %32, %cst_16 [1] : vector<48x128xf32> to vector<48xf32>
      %34 = vector.shape_cast %33 : vector<48xf32> to vector<48x1xf32>
      %cst_17 = arith.constant 1.280000e+02 : f32
      %35 = vector.broadcast %cst_17 : f32 to vector<48x1xf32>
      %36 = arith.divf %34, %35 : vector<48x1xf32>
      %cst_18 = arith.constant 9.99999997E-7 : f32
      %37 = vector.broadcast %cst_18 : f32 to vector<48x1xf32>
      %38 = arith.addf %36, %37 : vector<48x1xf32>
      %39 = math.rsqrt %38 : vector<48x1xf32>
      %40 = vector.broadcast %39 : vector<48x1xf32> to vector<48x128xf32>
      %41 = arith.mulf %31, %40 : vector<48x128xf32>
      %c0_19 = arith.constant 0 : index
      %c0_20 = arith.constant 0 : index
      %42 = vector.load %arg3[%c0_19, %c0_20] : memref<1x128xf32, #tpu.memory_space<vmem>>, vector<1x128xf32>
      %43 = vector.broadcast %42 : vector<1x128xf32> to vector<48x128xf32>
      %44 = arith.mulf %41, %43 : vector<48x128xf32>
      %c0_21 = arith.constant 0 : index
      %c0_22 = arith.constant 0 : index
      %45 = vector.load %arg4[%c0_21, %c0_22] : memref<1x128xf32, #tpu.memory_space<vmem>>, vector<1x128xf32>
      %46 = vector.broadcast %45 : vector<1x128xf32> to vector<48x128xf32>
      %47 = arith.addf %44, %46 : vector<48x128xf32>
      %48 = arith.truncf %47 : vector<48x128xf32> to vector<48x128xbf16>
      %c0_23 = arith.constant 0 : index
      %c0_24 = arith.constant 0 : index
      %49 = vector.load %arg8[%c0_23, %c0_24] : memref<48x128xbf16, #tpu.memory_space<vmem>>, vector<48x128xbf16>
      tpu.vector_store %arg8[%c0_23, %c0_24], %48 {strides = array<i32>} : memref<48x128xbf16, #tpu.memory_space<vmem>>, vector<48x128xbf16>,
    } else {
    }
    %c0 = arith.constant 0 : index
    %c0_1 = arith.constant 0 : index
    %3 = vector.load %arg8[%c0, %c0_1] : memref<48x128xbf16, #tpu.memory_space<vmem>>, vector<48x128xbf16>
    %c0_2 = arith.constant 0 : index
    %c0_3 = arith.constant 0 : index
    %4 = vector.load %arg5[%c0_2, %c0_3] : memref<128x256xbf16, #tpu.memory_space<vmem>>, vector<128x256xbf16>
    %cst = arith.constant dense<0.000000e+00> : vector<48x256xf32>
    %5 = tpu.matmul %3, %4, %cst {dimension_numbers = #tpu.dot_dimension_numbers<[1], [0], [0], [1], [0, 0, 1, 1], [], []>} : vector<48x128xbf16>, vector<128x256xbf16>, vector<48x256xf32> -> vector<48x256xf32>
    %c0_4 = arith.constant 0 : index
    %c0_5 = arith.constant 0 : index
    %6 = vector.load %arg6[%c0_4, %c0_5] : memref<1x256xf32, #tpu.memory_space<vmem>>, vector<1x256xf32>
    %7 = vector.broadcast %6 : vector<1x256xf32> to vector<48x256xf32>
    %8 = arith.addf %5, %7 : vector<48x256xf32>
    %9 = arith.mulf %8, %8 : vector<48x256xf32>
    %10 = arith.mulf %8, %9 : vector<48x256xf32>
    %cst_6 = arith.constant 4.471500e-02 : f32
    %11 = vector.broadcast %cst_6 : f32 to vector<48x256xf32>
    %12 = arith.mulf %11, %10 : vector<48x256xf32>
    %13 = arith.addf %8, %12 : vector<48x256xf32>
    %cst_7 = arith.constant 0.797884583 : f32
    %14 = vector.broadcast %cst_7 : f32 to vector<48x256xf32>
    %15 = arith.mulf %14, %13 : vector<48x256xf32>
    %16 = math.tanh %15 : vector<48x256xf32>
    %cst_8 = arith.constant 1.000000e+00 : f32
    %17 = vector.broadcast %cst_8 : f32 to vector<48x256xf32>
    %18 = arith.addf %17, %16 : vector<48x256xf32>
    %cst_9 = arith.constant 5.000000e-01 : f32
    %19 = vector.broadcast %cst_9 : f32 to vector<48x256xf32>
    %20 = arith.mulf %19, %18 : vector<48x256xf32>
    %21 = arith.mulf %8, %20 : vector<48x256xf32>
    %22 = arith.truncf %21 : vector<48x256xf32> to vector<48x256xbf16>
    %c0_10 = arith.constant 0 : index
    %c0_11 = arith.constant 0 : index
    %23 = vector.load %arg7[%c0_10, %c0_11] : memref<48x256xbf16, #tpu.memory_space<vmem>>, vector<48x256xbf16>
    tpu.vector_store %arg7[%c0_10, %c0_11], %22 {strides = array<i32>} : memref<48x256xbf16, #tpu.memory_space<vmem>>, vector<48x256xbf16>,
    return
  }
  func.func @transform_0(%arg0: i32, %arg1: i32) -> (i32, i32) {
    %c0_i32 = arith.constant 0 : i32
    %c0_i32_0 = arith.constant 0 : i32
    return %arg0, %c0_i32 : i32, i32
  }
  func.func @transform_1(%arg0: i32, %arg1: i32) -> (i32, i32) {
    %c0_i32 = arith.constant 0 : i32
    %c0_i32_0 = arith.constant 0 : i32
    %c0_i32_1 = arith.constant 0 : i32
    return %c0_i32, %c0_i32_0 : i32, i32
  }
  func.func @transform_2(%arg0: i32, %arg1: i32) -> (i32, i32) {
    %c0_i32 = arith.constant 0 : i32
    %c0_i32_0 = arith.constant 0 : i32
    %c0_i32_1 = arith.constant 0 : i32
    return %c0_i32, %c0_i32_0 : i32, i32
  }
  func.func @transform_3(%arg0: i32, %arg1: i32) -> (i32, i32) {
    %c0_i32 = arith.constant 0 : i32
    %c0_i32_0 = arith.constant 0 : i32
    return %c0_i32, %arg1 : i32, i32
  }
  func.func @transform_4(%arg0: i32, %arg1: i32) -> (i32, i32) {
    %c0_i32 = arith.constant 0 : i32
    %c0_i32_0 = arith.constant 0 : i32
    return %c0_i32, %arg1 : i32, i32
  }
  func.func @transform_5(%arg0: i32, %arg1: i32) -> (i32, i32) {
    %c0_i32 = arith.constant 0 : i32
    return %arg0, %arg1 : i32, i32
  }
}

module attributes {stable_mosaic.version = 11 : i64} {
  func.func @_matmul_residual_kernel(%arg0: i32, %arg1: i32, %arg2: i32, %arg3: memref<48x256xbf16, #tpu.memory_space<vmem>>, %arg4: memref<256x128xbf16, #tpu.memory_space<vmem>>, %arg5: memref<1x128xf32, #tpu.memory_space<vmem>>, %arg6: memref<48x128xbf16, #tpu.memory_space<vmem>>, %arg7: memref<48x128xbf16, #tpu.memory_space<vmem>>, %arg8: memref<48x128xf32, #tpu.memory_space<vmem>>) attributes {dimension_semantics = [#tpu.dimension_semantics<parallel>, #tpu.dimension_semantics<parallel>, #tpu.dimension_semantics<arbitrary>], iteration_bounds = array<i64: 1, 1, 1>, scalar_prefetch = 0 : i64, scratch_operands = 1 : i64, tpu.core_type = #tpu.core_type<tc>, window_params = [{transform_indices = @transform_0, window_bounds = array<i64: 48, 256>}, {transform_indices = @transform_1, window_bounds = array<i64: 256, 128>}, {transform_indices = @transform_2, window_bounds = array<i64: 1, 128>}, {transform_indices = @transform_3, window_bounds = array<i64: 48, 128>}, {transform_indices = @transform_4, window_bounds = array<i64: 48, 128>}]} {
    %c0_i32 = arith.constant 0 : i32
    %0 = arith.cmpi eq, %arg2, %c0_i32 : i32
    %1 = arith.extui %0 : i1 to i32
    %c0_i32_0 = arith.constant 0 : i32
    %2 = arith.cmpi ne, %1, %c0_i32_0 : i32
    scf.if %2 {
      %cst_10 = arith.constant 0.000000e+00 : f32
      %12 = vector.broadcast %cst_10 : f32 to vector<48x128xf32>
      %c0_11 = arith.constant 0 : index
      %c0_12 = arith.constant 0 : index
      %13 = vector.load %arg8[%c0_11, %c0_12] : memref<48x128xf32, #tpu.memory_space<vmem>>, vector<48x128xf32>
      tpu.vector_store %arg8[%c0_11, %c0_12], %12 {strides = array<i32>} : memref<48x128xf32, #tpu.memory_space<vmem>>, vector<48x128xf32>,
    } else {
    }
    %c0 = arith.constant 0 : index
    %c0_1 = arith.constant 0 : index
    %3 = vector.load %arg8[%c0, %c0_1] : memref<48x128xf32, #tpu.memory_space<vmem>>, vector<48x128xf32>
    %c0_2 = arith.constant 0 : index
    %c0_3 = arith.constant 0 : index
    %4 = vector.load %arg3[%c0_2, %c0_3] : memref<48x256xbf16, #tpu.memory_space<vmem>>, vector<48x256xbf16>
    %c0_4 = arith.constant 0 : index
    %c0_5 = arith.constant 0 : index
    %5 = vector.load %arg4[%c0_4, %c0_5] : memref<256x128xbf16, #tpu.memory_space<vmem>>, vector<256x128xbf16>
    %cst = arith.constant dense<0.000000e+00> : vector<48x128xf32>
    %6 = tpu.matmul %4, %5, %cst {dimension_numbers = #tpu.dot_dimension_numbers<[1], [0], [0], [1], [0, 0, 1, 1], [], []>} : vector<48x256xbf16>, vector<256x128xbf16>, vector<48x128xf32> -> vector<48x128xf32>
    %7 = arith.addf %3, %6 : vector<48x128xf32>
    %c0_6 = arith.constant 0 : index
    %c0_7 = arith.constant 0 : index
    %8 = vector.load %arg8[%c0_6, %c0_7] : memref<48x128xf32, #tpu.memory_space<vmem>>, vector<48x128xf32>
    tpu.vector_store %arg8[%c0_6, %c0_7], %7 {strides = array<i32>} : memref<48x128xf32, #tpu.memory_space<vmem>>, vector<48x128xf32>,
    %c0_i32_8 = arith.constant 0 : i32
    %9 = arith.cmpi eq, %arg2, %c0_i32_8 : i32
    %10 = arith.extui %9 : i1 to i32
    %c0_i32_9 = arith.constant 0 : i32
    %11 = arith.cmpi ne, %10, %c0_i32_9 : i32
    scf.if %11 {
      %c0_10 = arith.constant 0 : index
      %c0_11 = arith.constant 0 : index
      %12 = vector.load %arg8[%c0_10, %c0_11] : memref<48x128xf32, #tpu.memory_space<vmem>>, vector<48x128xf32>
      %c0_12 = arith.constant 0 : index
      %c0_13 = arith.constant 0 : index
      %13 = vector.load %arg5[%c0_12, %c0_13] : memref<1x128xf32, #tpu.memory_space<vmem>>, vector<1x128xf32>
      %14 = vector.broadcast %13 : vector<1x128xf32> to vector<48x128xf32>
      %15 = arith.addf %12, %14 : vector<48x128xf32>
      %c0_14 = arith.constant 0 : index
      %c0_15 = arith.constant 0 : index
      %16 = vector.load %arg6[%c0_14, %c0_15] : memref<48x128xbf16, #tpu.memory_space<vmem>>, vector<48x128xbf16>
      %17 = arith.extf %16 : vector<48x128xbf16> to vector<48x128xf32>
      %18 = arith.addf %15, %17 : vector<48x128xf32>
      %19 = arith.truncf %18 : vector<48x128xf32> to vector<48x128xbf16>
      %c0_16 = arith.constant 0 : index
      %c0_17 = arith.constant 0 : index
      %20 = vector.load %arg7[%c0_16, %c0_17] : memref<48x128xbf16, #tpu.memory_space<vmem>>, vector<48x128xbf16>
      tpu.vector_store %arg7[%c0_16, %c0_17], %19 {strides = array<i32>} : memref<48x128xbf16, #tpu.memory_space<vmem>>, vector<48x128xbf16>,
    } else {
    }
    return
  }
  func.func @transform_0(%arg0: i32, %arg1: i32, %arg2: i32) -> (i32, i32) {
    %c0_i32 = arith.constant 0 : i32
    return %arg0, %arg2 : i32, i32
  }
  func.func @transform_1(%arg0: i32, %arg1: i32, %arg2: i32) -> (i32, i32) {
    %c0_i32 = arith.constant 0 : i32
    return %arg2, %arg1 : i32, i32
  }
  func.func @transform_2(%arg0: i32, %arg1: i32, %arg2: i32) -> (i32, i32) {
    %c0_i32 = arith.constant 0 : i32
    %c0_i32_0 = arith.constant 0 : i32
    return %c0_i32, %arg1 : i32, i32
  }
  func.func @transform_3(%arg0: i32, %arg1: i32, %arg2: i32) -> (i32, i32) {
    %c0_i32 = arith.constant 0 : i32
    return %arg0, %arg1 : i32, i32
  }
  func.func @transform_4(%arg0: i32, %arg1: i32, %arg2: i32) -> (i32, i32) {
    %c0_i32 = arith.constant 0 : i32
    return %arg0, %arg1 : i32, i32
  }
}

module attributes {stable_mosaic.version = 11 : i64} {
  func.func @_layernorm_kernel(%arg0: i32, %arg1: memref<2x128xbf16, #tpu.memory_space<vmem>>, %arg2: memref<1x128xf32, #tpu.memory_space<vmem>>, %arg3: memref<1x128xf32, #tpu.memory_space<vmem>>, %arg4: memref<2x128xf32, #tpu.memory_space<vmem>>) attributes {dimension_semantics = [#tpu.dimension_semantics<parallel>], iteration_bounds = array<i64: 1>, scalar_prefetch = 0 : i64, scratch_operands = 0 : i64, tpu.core_type = #tpu.core_type<tc>, window_params = [{transform_indices = @transform_0, window_bounds = array<i64: 2, 128>}, {pipeline_mode = #tpu.pipeline_mode<synchronous>, transform_indices = @transform_1, window_bounds = array<i64: 1, 128>}, {pipeline_mode = #tpu.pipeline_mode<synchronous>, transform_indices = @transform_2, window_bounds = array<i64: 1, 128>}, {transform_indices = @transform_3, window_bounds = array<i64: 2, 128>}]} {
    %c0 = arith.constant 0 : index
    %c0_0 = arith.constant 0 : index
    %0 = vector.load %arg1[%c0, %c0_0] : memref<2x128xbf16, #tpu.memory_space<vmem>>, vector<2x128xbf16>
    %1 = arith.extf %0 : vector<2x128xbf16> to vector<2x128xf32>
    %cst = arith.constant dense<0.000000e+00> : vector<2xf32>
    %2 = vector.multi_reduction <add>, %1, %cst [1] : vector<2x128xf32> to vector<2xf32>
    %3 = vector.shape_cast %2 : vector<2xf32> to vector<2x1xf32>
    %cst_1 = arith.constant 1.280000e+02 : f32
    %4 = vector.broadcast %cst_1 : f32 to vector<2x1xf32>
    %5 = arith.divf %3, %4 : vector<2x1xf32>
    %6 = vector.broadcast %5 : vector<2x1xf32> to vector<2x128xf32>
    %7 = arith.subf %1, %6 : vector<2x128xf32>
    %8 = arith.mulf %7, %7 : vector<2x128xf32>
    %cst_2 = arith.constant dense<0.000000e+00> : vector<2xf32>
    %9 = vector.multi_reduction <add>, %8, %cst_2 [1] : vector<2x128xf32> to vector<2xf32>
    %10 = vector.shape_cast %9 : vector<2xf32> to vector<2x1xf32>
    %cst_3 = arith.constant 1.280000e+02 : f32
    %11 = vector.broadcast %cst_3 : f32 to vector<2x1xf32>
    %12 = arith.divf %10, %11 : vector<2x1xf32>
    %cst_4 = arith.constant 9.99999997E-7 : f32
    %13 = vector.broadcast %cst_4 : f32 to vector<2x1xf32>
    %14 = arith.addf %12, %13 : vector<2x1xf32>
    %15 = math.rsqrt %14 : vector<2x1xf32>
    %16 = vector.broadcast %15 : vector<2x1xf32> to vector<2x128xf32>
    %17 = arith.mulf %7, %16 : vector<2x128xf32>
    %c0_5 = arith.constant 0 : index
    %c0_6 = arith.constant 0 : index
    %18 = vector.load %arg2[%c0_5, %c0_6] : memref<1x128xf32, #tpu.memory_space<vmem>>, vector<1x128xf32>
    %19 = vector.broadcast %18 : vector<1x128xf32> to vector<2x128xf32>
    %20 = arith.mulf %17, %19 : vector<2x128xf32>
    %c0_7 = arith.constant 0 : index
    %c0_8 = arith.constant 0 : index
    %21 = vector.load %arg3[%c0_7, %c0_8] : memref<1x128xf32, #tpu.memory_space<vmem>>, vector<1x128xf32>
    %22 = vector.broadcast %21 : vector<1x128xf32> to vector<2x128xf32>
    %23 = arith.addf %20, %22 : vector<2x128xf32>
    %c0_9 = arith.constant 0 : index
    %c0_10 = arith.constant 0 : index
    %24 = vector.load %arg4[%c0_9, %c0_10] : memref<2x128xf32, #tpu.memory_space<vmem>>, vector<2x128xf32>
    tpu.vector_store %arg4[%c0_9, %c0_10], %23 {strides = array<i32>} : memref<2x128xf32, #tpu.memory_space<vmem>>, vector<2x128xf32>,
    return
  }
  func.func @transform_0(%arg0: i32) -> (i32, i32) {
    %c0_i32 = arith.constant 0 : i32
    %c0_i32_0 = arith.constant 0 : i32
    return %arg0, %c0_i32 : i32, i32
  }
  func.func @transform_1(%arg0: i32) -> (i32, i32) {
    %c0_i32 = arith.constant 0 : i32
    %c0_i32_0 = arith.constant 0 : i32
    %c0_i32_1 = arith.constant 0 : i32
    return %c0_i32, %c0_i32_0 : i32, i32
  }
  func.func @transform_2(%arg0: i32) -> (i32, i32) {
    %c0_i32 = arith.constant 0 : i32
    %c0_i32_0 = arith.constant 0 : i32
    %c0_i32_1 = arith.constant 0 : i32
    return %c0_i32, %c0_i32_0 : i32, i32
  }
  func.func @transform_3(%arg0: i32) -> (i32, i32) {
    %c0_i32 = arith.constant 0 : i32
    %c0_i32_0 = arith.constant 0 : i32
    return %arg0, %c0_i32 : i32, i32
  }
}

</mosaic_0001>

<bundles_post_ra>
// kernel: _lambda_.10
= control target key start
LH: loop header
LB: loop body
LE: loop exit
PB: predicated region body
PF: predicated region fallthrough
CT: control target
= control target key end

     0   :  { %v332_v0 = vmov 0   ;;  %vm145_vm0 = vcmask 523264   ;;  %s434_s1 = inlined_call_operand.vmem [shape: bf16[192,128], index: 1, kind: input, shape index: {}]   ;;  %s435_s0 = inlined_call_operand.vmem [shape: bf16[32,192], index: 0, kind: input, shape index: {}]   ;;  %s436_s2 = inlined_call_operand.vmem [shape: f32[1,128], index: 2, kind: input, shape index: {}]   ;;  %s437_s3 = inlined_call_operand.vmem [shape: bf16[32,128], index: 3, kind: output, shape index: {}]  }
   0x1   :  { %152 = vmatprep.subr.bf16.mxu0 %v332_v0  ;;  %289 = vmatprep.subr.bf16.mxu1 %v332_v0  ;;  %v314_v1 = vld [vmem:[%s434_s1] sm:$0xff]   ;;  %v315_v2 = vld [vmem:[%s434_s1 + $0x8] sm:$0xff]   ;;  %v316_v3 = vld [vmem:[%s434_s1 + $0x10] sm:$0xff]  }
   0x2   :  { %153 = vmatpush1.bf16.msra.mxu0 %v314_v1  ;;  %301 = vmatpush1.bf16.msra.mxu1 %v314_v1  ;;  %v317_v4 = vld [vmem:[%s434_s1 + $0x18] sm:$0xff]   ;;  %v328_v5 = vld [vmem:[%s435_s0 + $0x4] ss:$8 sps:$4 sm:$0xff]   ;;  %v320_v9 = vld [vmem:[%s434_s1 + $0x30] sm:$0xff]  }
   0x3   :  { %154 = vmatprep.subr.bf16.mxu0 %v332_v0  ;;  %290 = vmatprep.subr.bf16.mxu1 %v332_v0  ;;  %v318_v6 = vld [vmem:[%s434_s1 + $0x20] sm:$0xff]   ;;  %v331_v7 = vld [vmem:[%s435_s0 + $0x14] ss:$8 sps:$4 sm:$0xff]   ;;  %v319_v8 = vld [vmem:[%s434_s1 + $0x28] sm:$0xff]  }
   0x4   :  { %267 = vmatprep.mubr.msk.bf16.mxu0 %vm145_vm0, %v328_v5  ;;  %268 = vmatprep.mubr.msk.bf16.mxu1 %vm145_vm0, %v331_v7  ;;  %v321_v10 = vld [vmem:[%s434_s1 + $0x38] sm:$0xff]   ;;  %v322_v11 = vld [vmem:[%s434_s1 + $0x40] sm:$0xff]   ;;  %v323_v12 = vld [vmem:[%s434_s1 + $0x48] sm:$0xff]  }
   0x5   :  { %v324_v13 = vld [vmem:[%s434_s1 + $0x50] sm:$0xff]   ;;  %v325_v14 = vld [vmem:[%s434_s1 + $0x58] sm:$0xff]   ;;  %v326_v15 = vld [vmem:[%s435_s0] ss:$8 sps:$4 sm:$0xff]  }
   0x6   :  { %155 = vmatpush1.bf16.msra.mxu0 %v315_v2  ;;  %302 = vmatpush1.bf16.msra.mxu1 %v315_v2  ;;  %v329_v16 = vld [vmem:[%s435_s0 + $0x10] ss:$8 sps:$4 sm:$0xff]   ;;  %v269_v18 = vld [vmem:[%s436_s2] ss:$0 sm:$0xff] }
   0x7   :  { %156 = vmatprep.subr.bf16.mxu0 %v332_v0  ;;  %291 = vmatprep.subr.bf16.mxu1 %v332_v0 }
   0xa   :  { %157 = vmatpush1.bf16.msra.mxu0 %v316_v3  ;;  %303 = vmatpush1.bf16.msra.mxu1 %v316_v3 }
   0xb   :  { %158 = vmatprep.subr.bf16.mxu0 %v332_v0  ;;  %292 = vmatprep.subr.bf16.mxu1 %v332_v0 }
   0xe   :  { %159 = vmatpush1.bf16.msra.mxu0 %v317_v4  ;;  %304 = vmatpush1.bf16.msra.mxu1 %v317_v4 }
   0xf   :  { %160 = vmatprep.subr.bf16.mxu0 %v332_v0  ;;  %293 = vmatprep.subr.bf16.mxu1 %v332_v0 }
  0x12   :  { %161 = vmatpush1.bf16.msra.mxu0 %v318_v6  ;;  %305 = vmatpush1.bf16.msra.mxu1 %v318_v6 }
  0x13   :  { %162 = vmatprep.subr.bf16.mxu0 %v332_v0  ;;  %294 = vmatprep.subr.bf16.mxu1 %v332_v0 }
  0x16   :  { %163 = vmatpush1.bf16.msra.mxu0 %v319_v8  ;;  %306 = vmatpush1.bf16.msra.mxu1 %v319_v8 }
  0x17   :  { %164 = vmatprep.subr.bf16.mxu0 %v332_v0  ;;  %295 = vmatprep.subr.bf16.mxu1 %v332_v0 }
  0x1a   :  { %165 = vmatpush1.bf16.msra.mxu0 %v320_v9  ;;  %307 = vmatpush1.bf16.msra.mxu1 %v320_v9 }
  0x1b   :  { %166 = vmatprep.subr.bf16.mxu0 %v332_v0  ;;  %296 = vmatprep.subr.bf16.mxu1 %v332_v0 }
  0x1e   :  { %167 = vmatpush1.bf16.msra.mxu0 %v321_v10  ;;  %308 = vmatpush1.bf16.msra.mxu1 %v321_v10 }
  0x1f   :  { %168 = vmatprep.subr.bf16.mxu0 %v332_v0  ;;  %297 = vmatprep.subr.bf16.mxu1 %v332_v0 }
  0x22   :  { %169 = vmatpush1.bf16.msra.mxu0 %v322_v11  ;;  %309 = vmatpush1.bf16.msra.mxu1 %v322_v11 }
  0x23   :  { %170 = vmatprep.subr.bf16.mxu0 %v332_v0  ;;  %298 = vmatprep.subr.bf16.mxu1 %v332_v0 }
  0x26   :  { %171 = vmatpush1.bf16.msra.mxu0 %v323_v12  ;;  %310 = vmatpush1.bf16.msra.mxu1 %v323_v12 }
  0x27   :  { %172 = vmatprep.subr.bf16.mxu0 %v332_v0  ;;  %299 = vmatprep.subr.bf16.mxu1 %v332_v0 }
  0x2a   :  { %173 = vmatpush1.bf16.msra.mxu0 %v324_v13  ;;  %311 = vmatpush1.bf16.msra.mxu1 %v324_v13 }
  0x2b   :  { %174 = vmatprep.subr.bf16.mxu0 %v332_v0  ;;  %300 = vmatprep.subr.bf16.mxu1 %v332_v0 }
  0x2e   :  { %175 = vmatpush1.bf16.msra.mxu0 %v325_v14  ;;  %312 = vmatpush1.bf16.msra.mxu1 %v325_v14 }
  0x31   :  { %185 = vmatmul.mubr.bf16.vlgmr.msra.gmra.mrb[0].mxu0 %v326_v15  ;;  %193 = vmatmul.mubr.bf16.vlgmr.msra.gmra.mrb[0].mxu1 %v329_v16 }
 0x104   :  { %v186_v17 = vpop.f32.mrb[0].mxu0  ;;  %v194_v19 = vpop.f32.mrb[0].mxu1 }
 0x105   :  { %v188_v20 = vpop.f32.mrb[1].mxu0  ;;  %v196_v21 = vpop.f32.mrb[1].mxu1  ;;  %v223_v24 = vadd.f32 %v269_v18, %v186_v17  ;;  %v225_v25 = vadd.f32 %v269_v18, %v194_v19 }
 0x106   :  { %v189_v22 = vpop.f32.mrb[2].mxu0  ;;  %v197_v23 = vpop.f32.mrb[2].mxu1 }
 0x107   :  { %v224_v26 = vadd.f32 %v269_v18, %v189_v22  ;;  %v226_v27 = vadd.f32 %v269_v18, %v197_v23  ;;  %v191_v28 = vpop.f32.mrb[3].mxu0  ;;  %v199_v29 = vpop.f32.mrb[3].mxu1 }
 0x109   :  { %v281_v30 = vpack.c.bf16 %v224_v26, %v223_v24  ;;  %v286_v31 = vpack.c.bf16 %v226_v27, %v225_v25 }
 0x10b   :  { %282 = vst [vmem:[%s437_s3] sm:$0xff] %v281_v30   ;;  %288 = vst [vmem:[%s437_s3 + $0x8] sm:$0xff] %v286_v31  }

// kernel: _lambda_.11
= control target key start
LH: loop header
LB: loop body
LE: loop exit
PB: predicated region body
PF: predicated region fallthrough
CT: control target
= control target key end

     0   :  { %v662_v10 = vmov 0.0   ;;  %v663_v56 = vmov 0   ;;  %vm664_vm0 = vmmov 0   ;;  %s868_s0 = inlined_call_operand.vmem [shape: bf16[48,128], index: 0, kind: input, shape index: {}]   ;;  %s869_s3 = inlined_call_operand.vmem [shape: bf16[128,384], index: 3, kind: input, shape index: {}]   ;;  %s870_s1 = inlined_call_operand.vmem [shape: f32[1,128], index: 1, kind: input, shape index: {}]   ;;  %s871_s2 = inlined_call_operand.vmem [shape: f32[1,128], index: 2, kind: input, shape index: {}]   ;;  %s872_s4 = inlined_call_operand.vmem [shape: f32[1,384], index: 4, kind: input, shape index: {}]   ;;  %s873_s5 = inlined_call_operand.vmem [shape: bf16[48,384], index: 5, kind: output, shape index: {}]  }
   0x1   :  { %v563_v0 = vld [vmem:[%s868_s0] sm:$0xff]   ;;  %v574_v1 = vld [vmem:[%s868_s0 + $0x8] sm:$0xff]   ;;  %v575_v6 = vld [vmem:[%s868_s0 + $0x10] sm:$0xff]   ;;  %587 = vmatprep.subr.bf16.mxu1 %v662_v10  ;;  %348 = vmatprep.mubr.bf16.mxu0 %v663_v56 }
   0x2   :  { %v564_v2 = vunpack.c.l.bf16 %v563_v0  ;;  %v568_v3 = vunpack.c.l.bf16 %v574_v1  ;;  %v565_v4 = vunpack.c.h.bf16 %v563_v0  ;;  %v569_v5 = vunpack.c.h.bf16 %v574_v1  ;;  %v618_v9 = vld [vmem:[%s869_s3 + $0x4] ss:$12 sps:$4 sm:$0xff]   ;;  %v620_v11 = vld [vmem:[%s869_s3] ss:$12 sps:$4 sm:$0xff]   ;;  %v621_v12 = vld [vmem:[%s869_s3 + $0x8] ss:$12 sps:$4 sm:$0xff]   ;;  %603 = vmatprep.mubr.msk.bf16.mxu1 %vm664_vm0, %v662_v10 }
   0x3   :  { %v572_v7 = vunpack.c.l.bf16 %v575_v6  ;;  %v573_v8 = vunpack.c.h.bf16 %v575_v6  ;;  %316 = vmatprep.subr.bf16.mxu0 %v618_v9  ;;  %v622_v13 = vld [vmem:[%s869_s3 + $0x1c] ss:$12 sps:$4 sm:$0xff]   ;;  %588 = vmatpush3.bf16.msra.mxu1 %v621_v12  ;;  %v624_v38 = vld [vmem:[%s869_s3 + $0x18] ss:$12 sps:$4 sm:$0xff]   ;;  %v625_v39 = vld [vmem:[%s869_s3 + $0x20] ss:$12 sps:$4 sm:$0xff]  }
   0x4   :  { %37 = vadd.xlane.f32.xlu0 %v564_v2  ;;  %41 = vadd.xlane.f32.xlu1 %v568_v3  ;;  %v626_v40 = vld [vmem:[%s869_s3 + $0x34] ss:$12 sps:$4 sm:$0xff]   ;;  %v628_v41 = vld [vmem:[%s869_s3 + $0x30] ss:$12 sps:$4 sm:$0xff]   ;;  %v629_v42 = vld [vmem:[%s869_s3 + $0x38] ss:$12 sps:$4 sm:$0xff]  }
   0x5   :  { %317 = vmatpush1.bf16.msra.mxu0 %v620_v11  ;;  %589 = vmatprep.subr.bf16.mxu1 %v662_v10  ;;  %v630_v43 = vld [vmem:[%s869_s3 + $0x4c] ss:$12 sps:$4 sm:$0xff]   ;;  %v632_v44 = vld [vmem:[%s869_s3 + $0x48] ss:$12 sps:$4 sm:$0xff]   ;;  %v633_v45 = vld [vmem:[%s869_s3 + $0x50] ss:$12 sps:$4 sm:$0xff]  }
   0x6   :  { %318 = vmatprep.subr.bf16.mxu0 %v622_v13  ;;  %v634_v46 = vld [vmem:[%s869_s3 + $0x64] ss:$12 sps:$4 sm:$0xff]   ;;  %v636_v47 = vld [vmem:[%s869_s3 + $0x60] ss:$12 sps:$4 sm:$0xff]   ;;  %v637_v48 = vld [vmem:[%s869_s3 + $0x68] ss:$12 sps:$4 sm:$0xff]  }
   0x7   :  { %590 = vmatpush3.bf16.msra.mxu1 %v625_v39  ;;  %v638_v49 = vld [vmem:[%s869_s3 + $0x7c] ss:$12 sps:$4 sm:$0xff]   ;;  %v640_v50 = vld [vmem:[%s869_s3 + $0x78] ss:$12 sps:$4 sm:$0xff]   ;;  %v641_v51 = vld [vmem:[%s869_s3 + $0x80] ss:$12 sps:$4 sm:$0xff]  }
   0x8   :  { %39 = vadd.xlane.f32.xlu0 %v565_v4  ;;  %43 = vadd.xlane.f32.xlu1 %v569_v5  ;;  %v642_v52 = vld [vmem:[%s869_s3 + $0x94] ss:$12 sps:$4 sm:$0xff]   ;;  %v644_v53 = vld [vmem:[%s869_s3 + $0x90] ss:$12 sps:$4 sm:$0xff]   ;;  %v645_v54 = vld [vmem:[%s869_s3 + $0x98] ss:$12 sps:$4 sm:$0xff]  }
   0x9   :  { %319 = vmatpush1.bf16.msra.mxu0 %v624_v38  ;;  %591 = vmatprep.subr.bf16.mxu1 %v662_v10  ;;  %v646_v55 = vld [vmem:[%s869_s3 + $0xac] ss:$12 sps:$4 sm:$0xff]   ;;  %v648_v57 = vld [vmem:[%s869_s3 + $0xa8] ss:$12 sps:$4 sm:$0xff]   ;;  %v649_v58 = vld [vmem:[%s869_s3 + $0xb0] ss:$12 sps:$4 sm:$0xff]  }
   0xa   :  { %320 = vmatprep.subr.bf16.mxu0 %v626_v40 }
   0xb   :  { %592 = vmatpush3.bf16.msra.mxu1 %v629_v42 }
   0xc   :  { %45 = vadd.xlane.f32.xlu0 %v572_v7  ;;  %47 = vadd.xlane.f32.xlu1 %v573_v8 }
   0xd   :  { %321 = vmatpush1.bf16.msra.mxu0 %v628_v41  ;;  %593 = vmatprep.subr.bf16.mxu1 %v662_v10 }
   0xe   :  { %322 = vmatprep.subr.bf16.mxu0 %v630_v43 }
   0xf   :  { %594 = vmatpush3.bf16.msra.mxu1 %v633_v45  ;;  %v173_v45 = vlaneseq }
  0x10   :  { %595 = vmatprep.subr.bf16.mxu1 %v662_v10 }
  0x11   :  { %323 = vmatpush1.bf16.msra.mxu0 %v632_v44 }
  0x12   :  { %324 = vmatprep.subr.bf16.mxu0 %v634_v46 }
  0x13   :  { %596 = vmatpush3.bf16.msra.mxu1 %v637_v48 }
  0x14   :  { %597 = vmatprep.subr.bf16.mxu1 %v662_v10 }
  0x15   :  { %325 = vmatpush1.bf16.msra.mxu0 %v636_v47 }
  0x16   :  { %326 = vmatprep.subr.bf16.mxu0 %v638_v49 }
  0x17   :  { %598 = vmatpush3.bf16.msra.mxu1 %v641_v51 }
  0x18   :  { %599 = vmatprep.subr.bf16.mxu1 %v662_v10 }
  0x19   :  { %327 = vmatpush1.bf16.msra.mxu0 %v640_v50 }
  0x1a   :  { %328 = vmatprep.subr.bf16.mxu0 %v642_v52 }
  0x1b   :  { %600 = vmatpush3.bf16.msra.mxu1 %v645_v54 }
  0x1c   :  { %601 = vmatprep.subr.bf16.mxu1 %v662_v10 }
  0x1d   :  { %329 = vmatpush1.bf16.msra.mxu0 %v644_v53 }
  0x1e   :  { %330 = vmatprep.subr.bf16.mxu0 %v646_v55 }
  0x1f   :  { %602 = vmatpush3.bf16.msra.mxu1 %v649_v58 }
  0x21   :  { %331 = vmatpush1.bf16.msra.mxu0 %v648_v57 }
  0x91   :  { %v38_v14 = vpop.xlane.xlu0 %37  ;;  %v42_v15 = vpop.xlane.xlu1 %41 }
  0x92   :  { %v50_v16 = vmul.f32 0.0078125, %v38_v14  ;;  %v52_v17 = vmul.f32 0.0078125, %v42_v15 }
  0x94   :  { %v718_v18 = vsub.f32 %v564_v2, %v50_v16  ;;  %v720_v19 = vsub.f32 %v568_v3, %v52_v17  ;;  %v512_v16 = vld [vmem:[%s870_s1] ss:$0 sm:$0xff] }
  0x95   :  { %v40_v20 = vpop.xlane.xlu0 %39  ;;  %v44_v21 = vpop.xlane.xlu1 %43 }
  0x96   :  { %v51_v22 = vmul.f32 0.0078125, %v40_v20  ;;  %v62_v23 = vmul.f32 %v718_v18, %v718_v18  ;;  %v53_v24 = vmul.f32 0.0078125, %v44_v21  ;;  %v64_v27 = vmul.f32 %v720_v19, %v720_v19 }
  0x98   :  { %v724_v25 = vsub.f32 %v565_v4, %v51_v22  ;;  %68 = vadd.xlane.f32.xlu0 %v62_v23  ;;  %v726_v26 = vsub.f32 %v569_v5, %v53_v24  ;;  %v513_v23 = vld [vmem:[%s871_s2] ss:$0 sm:$0xff] }
  0x99   :  { %v46_v28 = vpop.xlane.xlu0 %45  ;;  %v48_v29 = vpop.xlane.xlu1 %47 }
  0x9a   :  { %v54_v30 = vmul.f32 0.0078125, %v46_v28  ;;  %v63_v31 = vmul.f32 %v724_v25, %v724_v25  ;;  %v55_v32 = vmul.f32 0.0078125, %v48_v29  ;;  %v65_v35 = vmul.f32 %v726_v26, %v726_v26 }
  0x9c   :  { %v732_v33 = vsub.f32 %v572_v7, %v54_v30  ;;  %72 = vadd.xlane.f32.xlu0 %v64_v27  ;;  %70 = vadd.xlane.f32.xlu1 %v63_v31  ;;  %v734_v34 = vsub.f32 %v573_v8, %v55_v32 }
  0x9e   :  { %v66_v36 = vmul.f32 %v732_v33, %v732_v33  ;;  %v67_v37 = vmul.f32 %v734_v34, %v734_v34 }
  0xa0   :  { %74 = vadd.xlane.f32.xlu1 %v65_v35  ;;  %76 = vadd.xlane.f32.xlu0 %v66_v36 }
  0xa4   :  { %78 = vadd.xlane.f32.xlu1 %v67_v37 }
 0x125   :  { %v69_v59 = vpop.xlane.xlu0 %68 }
 0x126   :  { %v80_v60 = vmul.f32 0.0078125, %v69_v59 }
 0x128   :  { %v86_v61 = vadd.f32 1e-06, %v80_v60 }
 0x129   :  { %v71_v62 = vpop.xlane.xlu1 %70  ;;  %v73_v63 = vpop.xlane.xlu0 %72 }
 0x12a   :  { %650 = vrsqrt.f32 %v86_v61  ;;  %v81_v0 = vmul.f32 0.0078125, %v71_v62  ;;  %v82_v1 = vmul.f32 0.0078125, %v73_v63 }
 0x12c   :  { %v87_v2 = vadd.f32 1e-06, %v81_v0  ;;  %v88_v3 = vadd.f32 1e-06, %v82_v1 }
 0x12d   :  { %v75_v4 = vpop.xlane.xlu1 %74  ;;  %v77_v5 = vpop.xlane.xlu0 %76 }
 0x12e   :  { %652 = vrsqrt.f32 %v87_v2  ;;  %v83_v6 = vmul.f32 0.0078125, %v75_v4  ;;  %v84_v8 = vmul.f32 0.0078125, %v77_v5 }
 0x12f   :  { %654 = vrsqrt.f32 %v88_v3 }
 0x130   :  { %v89_v7 = vadd.f32 1e-06, %v83_v6  ;;  %v90_v13 = vadd.f32 1e-06, %v84_v8 }
 0x131   :  { %v79_v9 = vpop.xlane.xlu1 %78 }
 0x132   :  { %656 = vrsqrt.f32 %v89_v7  ;;  %v85_v11 = vmul.f32 0.0078125, %v79_v9 }
 0x134   :  { %v651_v12 = vpop.eup %650  ;;  %v91_v14 = vadd.f32 1e-06, %v85_v11 }
 0x135   :  { %v98_v15 = vmul.f32 %v651_v12, %v718_v18 }
 0x136   :  { %658 = vrsqrt.f32 %v91_v14 }
 0x137   :  { %660 = vrsqrt.f32 %v90_v13  ;;  %v111_v21 = vmul.f32 %v512_v16, %v98_v15 }
 0x138   :  { %v653_v17 = vpop.eup %652 }
 0x139   :  { %v99_v20 = vmul.f32 %v653_v17, %v724_v25  ;;  %v655_v22 = vpop.eup %654  ;;  %v124_v28 = vadd.f32 %v513_v23, %v111_v21 }
 0x13a   :  { %v100_v18 = vmul.f32 %v655_v22, %v720_v19 }
 0x13b   :  { %v112_v24 = vmul.f32 %v512_v16, %v99_v20 }
 0x13c   :  { %v657_v27 = vpop.eup %656  ;;  %v113_v25 = vmul.f32 %v512_v16, %v100_v18 }
 0x13d   :  { %v125_v29 = vadd.f32 %v513_v23, %v112_v24  ;;  %v101_v30 = vmul.f32 %v657_v27, %v726_v26 }
 0x13e   :  { %v126_v39 = vadd.f32 %v513_v23, %v113_v25 }
 0x13f   :  { %v130_v31 = vpack.c.bf16 %v125_v29, %v124_v28  ;;  %v114_v32 = vmul.f32 %v512_v16, %v101_v30 }
 0x140   :  { %v659_v35 = vpop.eup %658 }
 0x141   :  { %349 = vmatmul.mubr.bf16.vlgmr.msra.gmra.mrb[0].mxu0 %v130_v31  ;;  %604 = vmatmul.mubr.bf16.vlgmr.msra.gmra.mrb[0].mxu1 %v130_v31  ;;  %v661_v36 = vpop.eup %660  ;;  %v127_v37 = vadd.f32 %v513_v23, %v114_v32  ;;  %v103_v38 = vmul.f32 %v659_v35, %v734_v34  ;;  %v174_v34 = vshrl.u32 %v173_v45, 7 }
 0x142   :  { %358 = vmatprep.mubr.bf16.mxu0 %v663_v56  ;;  %607 = vmatprep.mubr.msk.bf16.mxu1 %vm664_vm0, %v662_v10  ;;  %v102_v19 = vmul.f32 %v661_v36, %v732_v33  ;;  %v171_v33 = vld [vmem:[%s872_s4] sm:$0x7] }
 0x143   :  { %v131_v40 = vpack.c.bf16 %v127_v37, %v126_v39  ;;  %v116_v26 = vmul.f32 %v512_v16, %v103_v38  ;;  %v175_v46 = vsub.s32 0, %v174_v34  ;;  %v183_v47 = vsub.s32 2, %v174_v34 }
 0x144   :  { %v115_v41 = vmul.f32 %v512_v16, %v102_v19  ;;  %v179_v48 = vsub.s32 1, %v174_v34 }
 0x145   :  { %v129_v42 = vadd.f32 %v513_v23, %v116_v26  ;;  %v176_v49 = vrot.slane %v171_v33, %v175_v46  ;;  %v184_v50 = vrot.slane %v171_v33, %v183_v47 }
 0x146   :  { %v128_v43 = vadd.f32 %v513_v23, %v115_v41  ;;  %v180_v51 = vrot.slane %v171_v33, %v179_v48 }
 0x148   :  { %v132_v44 = vpack.c.bf16 %v129_v42, %v128_v43 }
 0x149   :  { %359 = vmatmul.mubr.bf16.gmra.mrb[4].mxu0 %v131_v40  ;;  %608 = vmatmul.mubr.bf16.gmra.mrb[4].mxu1 %v131_v40 }
 0x14a   :  { %368 = vmatprep.mubr.bf16.mxu0 %v663_v56  ;;  %611 = vmatprep.mubr.msk.bf16.mxu1 %vm664_vm0, %v662_v10 }
 0x151   :  { %369 = vmatmul.mubr.bf16.gmra.mrb[8].mxu0 %v132_v44  ;;  %612 = vmatmul.mubr.bf16.gmra.mrb[8].mxu1 %v132_v44 }
 0x214   :  { %v350_v52 = vpop.f32.mrb[0].mxu0  ;;  %v413_v53 = vpop.f32.mrb[0].mxu1 }
 0x215   :  { %v351_v10 = vadd.f32 %v350_v52, %v176_v49  ;;  %v414_v54 = vadd.f32 %v413_v53, %v184_v50  ;;  %v352_v55 = vpop.f32.mrb[1].mxu0  ;;  %v605_v56 = vpop.f32.mrb[1].mxu1 }
 0x216   :  { %v353_v57 = vadd.f32 %v352_v55, %v180_v51  ;;  %v354_v58 = vpop.f32.mrb[2].mxu0  ;;  %v416_v59 = vpop.f32.mrb[2].mxu1 }
 0x217   :  { %v551_v60 = vpack.c.bf16 %v414_v54, %v414_v54  ;;  %v355_v61 = vadd.f32 %v354_v58, %v176_v49  ;;  %v417_v62 = vadd.f32 %v416_v59, %v184_v50  ;;  %v356_v63 = vpop.f32.mrb[3].mxu0  ;;  %v606_v0 = vpop.f32.mrb[3].mxu1 }
 0x218   :  { %v550_v1 = vpack.c.bf16 %v353_v57, %v351_v10  ;;  %v357_v2 = vadd.f32 %v356_v63, %v180_v51 }
 0x219   :  { %497 = vst [vmem:[%s873_s5 + $0x8] sm:$0xf] %v551_v60  ;;  %v553_v3 = vpack.c.bf16 %v417_v62, %v417_v62 }
 0x21a   :  { %496 = vst [vmem:[%s873_s5] sm:$0xff] %v550_v1  ;;  %v552_v4 = vpack.c.bf16 %v357_v2, %v355_v61 }
 0x21b   :  { %499 = vst [vmem:[%s873_s5 + $0x14] sm:$0xf] %v553_v3 }
 0x21c   :  { %498 = vst [vmem:[%s873_s5 + $0xc] sm:$0xff] %v552_v4  ;;  %v360_v5 = vpop.f32.mrb[4].mxu0  ;;  %v421_v6 = vpop.f32.mrb[4].mxu1 }
 0x21d   :  { %v361_v7 = vadd.f32 %v360_v5, %v176_v49  ;;  %v422_v8 = vadd.f32 %v421_v6, %v184_v50  ;;  %v362_v9 = vpop.f32.mrb[5].mxu0  ;;  %v609_v11 = vpop.f32.mrb[5].mxu1 }
 0x21e   :  { %v363_v12 = vadd.f32 %v362_v9, %v180_v51  ;;  %v364_v13 = vpop.f32.mrb[6].mxu0  ;;  %v424_v14 = vpop.f32.mrb[6].mxu1 }
 0x21f   :  { %v555_v15 = vpack.c.bf16 %v422_v8, %v422_v8  ;;  %v365_v16 = vadd.f32 %v364_v13, %v176_v49  ;;  %v425_v17 = vadd.f32 %v424_v14, %v184_v50  ;;  %v366_v20 = vpop.f32.mrb[7].mxu0  ;;  %v610_v21 = vpop.f32.mrb[7].mxu1 }
 0x220   :  { %v554_v22 = vpack.c.bf16 %v363_v12, %v361_v7  ;;  %v367_v23 = vadd.f32 %v366_v20, %v180_v51 }
 0x221   :  { %501 = vst [vmem:[%s873_s5 + $0x20] sm:$0xf] %v555_v15  ;;  %v557_v24 = vpack.c.bf16 %v425_v17, %v425_v17 }
 0x222   :  { %500 = vst [vmem:[%s873_s5 + $0x18] sm:$0xff] %v554_v22  ;;  %v556_v27 = vpack.c.bf16 %v367_v23, %v365_v16 }
 0x223   :  { %503 = vst [vmem:[%s873_s5 + $0x2c] sm:$0xf] %v557_v24 }
 0x224   :  { %502 = vst [vmem:[%s873_s5 + $0x24] sm:$0xff] %v556_v27  ;;  %v370_v28 = vpop.f32.mrb[8].mxu0  ;;  %v429_v29 = vpop.f32.mrb[8].mxu1 }
 0x225   :  { %v371_v18 = vadd.f32 %v370_v28, %v176_v49  ;;  %v430_v30 = vadd.f32 %v429_v29, %v184_v50  ;;  %v372_v31 = vpop.f32.mrb[9].mxu0  ;;  %v613_v32 = vpop.f32.mrb[9].mxu1 }
 0x226   :  { %v373_v35 = vadd.f32 %v372_v31, %v180_v51  ;;  %v374_v25 = vpop.f32.mrb[10].mxu0  ;;  %v432_v36 = vpop.f32.mrb[10].mxu1 }
 0x227   :  { %v559_v37 = vpack.c.bf16 %v430_v30, %v430_v30  ;;  %v375_v38 = vadd.f32 %v374_v25, %v176_v49  ;;  %v433_v39 = vadd.f32 %v432_v36, %v184_v50  ;;  %v376_v19 = vpop.f32.mrb[11].mxu0  ;;  %v614_v40 = vpop.f32.mrb[11].mxu1 }
 0x228   :  { %v558_v26 = vpack.c.bf16 %v373_v35, %v371_v18  ;;  %v377_v41 = vadd.f32 %v376_v19, %v180_v51 }
 0x229   :  { %505 = vst [vmem:[%s873_s5 + $0x38] sm:$0xf] %v559_v37  ;;  %v561_v42 = vpack.c.bf16 %v433_v39, %v433_v39 }
 0x22a   :  { %504 = vst [vmem:[%s873_s5 + $0x30] sm:$0xff] %v558_v26  ;;  %v560_v43 = vpack.c.bf16 %v377_v41, %v375_v38 }
 0x22b   :  { %507 = vst [vmem:[%s873_s5 + $0x44] sm:$0xf] %v561_v42 }
 0x22c   :  { %506 = vst [vmem:[%s873_s5 + $0x3c] sm:$0xff] %v560_v43 }

// kernel: _lambda_.12
= control target key start
LH: loop header
LB: loop body
LE: loop exit
PB: predicated region body
PF: predicated region fallthrough
CT: control target
= control target key end

     0   :  { %s2045_s21 = smov 0   ;;  %s2047_s22 = smov 0   ;;  %s2377_s0 = inlined_call_operand.vmem [shape: bf16[2,24,384], index: 0, kind: input, shape index: {}, may-alias: {0,1,2}]   ;;  %s2378_s1 = inlined_call_operand.vmem [shape: bf16[2,24,384], index: 1, kind: input, shape index: {}, may-alias: {0,1,2}]   ;;  %s2379_s2 = inlined_call_operand.vmem [shape: bf16[2,24,384], index: 2, kind: input, shape index: {}, may-alias: {0,1,2}]   ;;  %s2380_s3 = inlined_call_operand.vmem [shape: bf16[1,128,128], index: 3, kind: input, shape index: {}]   ;;  %s2381_s4 = inlined_call_operand.vmem [shape: f32[1,128], index: 4, kind: input, shape index: {}]   ;;  %s2382_s5 = inlined_call_operand.vmem [shape: bf16[2,24,128], index: 5, kind: input, shape index: {}]   ;;  %s2383_s6 = inlined_call_operand.vmem [shape: bf16[2,24,128], index: 6, kind: output, shape index: {}]  }
   0x1   :  { %s2049_s23 = smov 0   ;;  %s2051_s24 = smov 0  }
   0x2   :  { %s2053_s25 = smov 0  }
   0x3 LB: > { %s35_s26 = sadd.s32 1, %s2001_s24  ;;  %p53_p1 = scmp.ne.s32.totalorder %s1993_s22, %s1989_s21  ;;  %s2005_s25 = sphi %s2053_s25, %s16_s25   ;;  %s2001_s24 = sphi %s2051_s24, %s2388_s24   ;;  %s1997_s23 = sphi %s2049_s23, %s2387_s23   ;;  %s1993_s22 = sphi %s2047_s22, %s2386_s22   ;;  %s1989_s21 = sphi %s2045_s21, %s2385_s21  }
   0x4   : > { %p37_p0 = scmp.ge.s32.totalorder %s35_s26, 2  ;;  %p54_p2 = scmp.eq.s32.totalorder %s2005_s25, 0 }
   0x5   : > { %s46_s29 = sadd.s32 1, %s1993_s22  ;;  %p1642_p5 = scmp.ge.s32.totalorder %s2005_s25, 2 }
   0x6   : > { %s2390_s26 = smov (%p37_p0, %s35_s26), 0  ;;  %p2076_p3 = por %p54_p2, %p53_p1 }
   0x7   : > { %s39_s28 = ssub.s32 %s2001_s24, %s2390_s26  ;;  %253 = sbr.rel (%p1642_p5) target bundleno = 35 (0x23), region = 24 }
   0x8   : > { %p44_p4 = scmp.eq.s32.totalorder %s39_s28, 0 }
   0xa   : > { %s2084_s30 = scalar_select %p44_p4, %s1993_s22, %s46_s29  }
   0xe   : > { %256 = sbr.rel (!%p2076_p3) target bundleno = 21 (0x15), region = 28  ;;  %s258_s7 = sand.u32 (%p2076_p3), 1, %s1993_s22  }
   0xf   : > { %s1842_s8 = smul.u32 (%p2076_p3), 36, %s2001_s24 }
  0x10   : > { %s1841_s9 = smul.u32 (%p2076_p3), 12, %s258_s7 }
  0x11   : > { %s267_s12 = scalar_lea.vmem (%p2076_p3), %s2377_s0, %s1842_s8 }
  0x12   : > { %v283_v0 = vld [vmem:[%s267_s12] sm:$0xf] (%p2076_p3)  ;;  %v285_v1 = vld [vmem:[%s267_s12 + $0xc] sm:$0xf] (%p2076_p3)  ;;  %s260_s13 = scalar_lea.vmem (%p2076_p3), [#allocation3], %s1841_s9 }
  0x13   : > { %284 = vst [vmem:[%s260_s13] sm:$0xf] (%p2076_p3), %v283_v0  ;;  %286 = vst [vmem:[%s260_s13 + $0x4] sm:$0xf] (%p2076_p3), %v285_v1  ;;  %v287_v2 = vld [vmem:[%s267_s12 + $0x18] sm:$0xf] (%p2076_p3) }
  0x14   : > { %288 = vst [vmem:[%s260_s13 + $0x8] sm:$0xf] (%p2076_p3), %v287_v2 }
  0x15 PF: > { %317 = sbr.rel (!%p2076_p3) target bundleno = 28 (0x1c), region = 69  ;;  %s319_s14 = sand.u32 (%p2076_p3), 1, %s1993_s22  }
  0x16   : > { %s1644_s15 = smul.u32 (%p2076_p3), 36, %s2001_s24 }
  0x17   : > { %s1843_s16 = smul.u32 (%p2076_p3), 12, %s319_s14 }
  0x18   : > { %s1514_s19 = scalar_lea.vmem (%p2076_p3), %s2378_s1, %s1644_s15 }
  0x19   : > { %v1645_v3 = vld [vmem:[%s1514_s19 + $0x4] sm:$0xf] (%p2076_p3)  ;;  %v1646_v4 = vld [vmem:[%s1514_s19 + $0x10] sm:$0xf] (%p2076_p3)  ;;  %s321_s20 = scalar_lea.vmem (%p2076_p3), [#allocation4], %s1843_s16 }
  0x1a   : > { %343 = vst [vmem:[%s321_s20] sm:$0xf] (%p2076_p3), %v1645_v3  ;;  %345 = vst [vmem:[%s321_s20 + $0x4] sm:$0xf] (%p2076_p3), %v1646_v4  ;;  %v1647_v5 = vld [vmem:[%s1514_s19 + $0x1c] sm:$0xf] (%p2076_p3) }
  0x1b   : > { %347 = vst [vmem:[%s321_s20 + $0x8] sm:$0xf] (%p2076_p3), %v1647_v5 }
  0x1c PF: > { %376 = sbr.rel (!%p2076_p3) target bundleno = 35 (0x23), region = 110  ;;  %s378_s28 = sand.u32 (%p2076_p3), 1, %s1993_s22  }
  0x1d   : > { %s1648_s29 = smul.u32 (%p2076_p3), 36, %s2001_s24 }
  0x1e   : > { %s1844_s7 = smul.u32 (%p2076_p3), 12, %s378_s28 }
  0x1f   : > { %s1521_s10 = scalar_lea.vmem (%p2076_p3), %s2379_s2, %s1648_s29 }
  0x20   : > { %v1649_v6 = vld [vmem:[%s1521_s10 + $0x8] sm:$0xf] (%p2076_p3)  ;;  %v1650_v7 = vld [vmem:[%s1521_s10 + $0x14] sm:$0xf] (%p2076_p3)  ;;  %s380_s11 = scalar_lea.vmem (%p2076_p3), [#allocation5], %s1844_s7 }
  0x21   : > { %402 = vst [vmem:[%s380_s11] sm:$0xf] (%p2076_p3), %v1649_v6  ;;  %404 = vst [vmem:[%s380_s11 + $0x4] sm:$0xf] (%p2076_p3), %v1650_v7  ;;  %v1651_v8 = vld [vmem:[%s1521_s10 + $0x20] sm:$0xf] (%p2076_p3) }
  0x22   : > { %406 = vst [vmem:[%s380_s11 + $0x8] sm:$0xf] (%p2076_p3), %v1651_v8 }
  0x23 PF: > { %p1652_p6 = scmp.ge.s32.totalorder %s2005_s25, 1  ;;  %p447_p7 = scmp.lt.s32.totalorder %s2005_s25, 3 }
  0x25   : > { %p448_p8 = pnand %p1652_p6, %p447_p7 }
  0x26   : > { %s454_s27 = sand.u32 (!%p448_p8), 1, %s1989_s21   ;;  %vm584_vm0 = vcmask (!%p448_p8), 261120   ;;  %v645_v15 = vlaneseq (!%p448_p8)  ;;  %vm651_vm2 = vcmask (!%p448_p8), 195584   ;;  %s2007_s21 = smov (!%p448_p8), 96   ;;  %vm696_vm3 = vcmask (!%p448_p8), 1043456  }
  0x27   : > { %451 = sbr.rel (%p448_p8) target bundleno = 2183 (0x887), region = 155  ;;  %s2008_s16 = smov (!%p448_p8), 64   ;;  %vm1297_vm4 = vcmask (!%p448_p8), 523264   ;;  %vm1301_vm5 = vcmask (!%p448_p8), 785408  }
  0x28   : > { %s2111_s12 = smul.u32 (!%p448_p8), 12, %s454_s27  ;;  %v2135_v16 = vand.u32 (!%p448_p8), 127, %v645_v15  ;;  %s2009_s17 = smov (!%p448_p8), 32  }
  0x29   : > { %p532_p9 = scmp.lt.s32.totalorder (!%p448_p8), %s1997_s23, 1 }
  0x2a   : > { %s463_s13 = scalar_lea.vmem (!%p448_p8), [#allocation4], %s2111_s12  ;;  %s456_s14 = scalar_lea.vmem (!%p448_p8), [#allocation3], %s2111_s12  ;;  %vm647_vm1 = vcmp.lt.s32.totalorder (!%p448_p8), %v2135_v16, 17 }
  0x2b   : > { %v2114_v9 = vld [vmem:[%s463_s13] sm:$0xff] (!%p448_p8)   ;;  %v2116_v10 = vld [vmem:[%s463_s13 + $0x8] ss:$0 sps:$4 sm:$0xff] (!%p448_p8)   ;;  %v2131_v14 = vld [vmem:[%s456_s14 + $0x8] ss:$0 sps:$4 sm:$0xff] (!%p448_p8)   ;;  %s470_s15 = scalar_lea.vmem (!%p448_p8), [#allocation5], %s2111_s12 }
  0x2c   : > { %1829 = vmatprep.subr.msk.bf16.mxu1 (!%p448_p8), %vm584_vm0, %v2114_v9  ;;  %v592_v11 = vsel (!%p448_p8), %vm584_vm0, %v2114_v9, 0  ;;  %v2123_v12 = vld [vmem:[%s456_s14] sm:$0xff] (!%p448_p8)   ;;  %v595_v13 = vsel (!%p448_p8), %vm584_vm0, %v2116_v10, 0  ;;  %v2152_v27 = vld [vmem:[%s470_s15] sm:$0xff] (!%p448_p8)   ;;  %v2155_v28 = vld [vmem:[%s470_s15 + $0x8] ss:$0 sps:$4 sm:$0xff] (!%p448_p8)  }
  0x2d   : > { %1746 = vmatpush3.bf16.xpose.msra.mxu1 (!%p448_p8), %v592_v11  ;;  %1749 = vmatprep.mubr.msk.bf16.mxu1 (!%p448_p8), %vm584_vm0, %v2123_v12  ;;  %v698_v29 = vsel (!%p448_p8), %vm696_vm3, %v2155_v28, 0 }
  0x2e   : > { %1830 = vmatprep.subr.msk.bf16.mxu1 %vm584_vm0, %v2116_v10  ;;  %s2392_s23 = smov (!%p532_p9, %s1997_s23), 1 }
  0x35   : > { %1748 = vmatpush3.bf16.xpose.msra.mxu1 %v595_v13 }
  0x36   : > { %1753 = vmatprep.subr.bf16.mxu1 %v2152_v27 }
  0x3c   : > { %1750 = vmatmul.mubr.msk.bf16.vlgmr.msra.gmra.mrb[0].mxu1 %vm584_vm0, %v2131_v14 }
  0x3d   : > { %1754 = vmatpush3.bf16.msra.mxu1 %v2152_v27 }
  0x3e   : > { %1831 = vmatprep.subr.msk.bf16.mxu1 %vm696_vm3, %v2155_v28 }
  0x41   : > { %1756 = vmatpush3.bf16.msra.mxu1 %v698_v29 }
 0x10f   : > { %v1751_v17 = vpop.f32.mrb[0].mxu1 }
 0x110   : > { %v650_v18 = vsel %vm647_vm1, %v1751_v17, -inf  ;;  %v631_v19 = vpop.f32.mrb[1].mxu1 }
 0x111   : > { %v648_v20 = vsel %vm647_vm1, %v631_v19, -inf  ;;  %v1752_v21 = vpop.f32.mrb[2].mxu1  ;;  %v658_v22 = vsel %vm651_vm2, %v650_v18, -inf }
 0x112   : > { %659 = vmax.xlane.f32.xlu1 %v658_v22  ;;  %v634_v23 = vpop.f32.mrb[3].mxu1  ;;  %v652_v24 = vsel %vm651_vm2, %v648_v20, -inf }
 0x113   : > { %v649_v25 = vsel %vm647_vm1, %v634_v23, -inf  ;;  %653 = vmax.xlane.f32.xlu0 %v652_v24 }
 0x114   : > { %v655_v26 = vsel %vm651_vm2, %v649_v25, -inf }
 0x117   : > { %656 = vmax.xlane.f32.xlu0 %v655_v26 }
 0x123   : > { %758 = vrot.lane.b32.xlu1 %v2114_v9, %s2007_s21 }
 0x127   : > { %754 = vrot.lane.b32.xlu1 %v2123_v12, %s2007_s21 }
 0x12b   : > { %756 = vrot.lane.b32.xlu1 %v2131_v14, %s2007_s21 }
 0x12d   : > { %760 = vrot.lane.b32.xlu0 %v2116_v10, %s2007_s21 }
 0x19f   : > { %v660_v30 = vpop.xlane.xlu1 %659 }
 0x1a0   : > { %v663_v31 = vsub.f32 %v650_v18, %v660_v30  ;;  %v654_v32 = vpop.xlane.xlu0 %653 }
 0x1a1   : > { %v661_v33 = vsub.f32 %v648_v20, %v654_v32 }
 0x1a2   : > { %v668_v34 = vmul.f32 1.442695, %v663_v31 }
 0x1a3   : > { %v759_v35 = vpop.permute.xlu1 %758  ;;  %v664_v36 = vmul.f32 1.442695, %v661_v33 }
 0x1a4   : > { %v657_v37 = vpop.xlane.xlu0 %656  ;;  %1832 = vmatprep.subr.msk.bf16.mxu1 %vm584_vm0, %v759_v35  ;;  %1919 = vpow2.f32 %v668_v34  ;;  %v769_v44 = vsel %vm584_vm0, %v759_v35, 0 }
 0x1a5   : > { %v662_v38 = vsub.f32 %v649_v25, %v657_v37  ;;  %1921 = vpow2.f32 %v664_v36 }
 0x1a7   : > { %v666_v39 = vmul.f32 1.442695, %v662_v38  ;;  %v755_v46 = vpop.permute.xlu1 %754 }
 0x1a8   : > { %v761_v47 = vpop.permute.xlu0 %760 }
 0x1a9   : > { %1923 = vpow2.f32 %v666_v39  ;;  %v772_v48 = vsel %vm584_vm0, %v761_v47, 0 }
 0x1ab   : > { %v757_v49 = vpop.permute.xlu1 %756 }
 0x1ae   : > { %v2167_v40 = vpop.eup %1919 }
 0x1af   : > { %v2169_v41 = vpop.eup %1921  ;;  %v680_v45 = vpack.c.bf16 %v2167_v40, %v2167_v40 }
 0x1b3   : > { %v2171_v42 = vpop.eup %1923 }
 0x1b4   : > { %v679_v43 = vpack.c.bf16 %v2171_v42, %v2169_v41 }
 0x1b6   : > { %1757 = vmatprep.mubr.msk.bf16.mxu1 %vm651_vm2, %v679_v43 }
 0x1b7   : > { %1758 = vmatmul.mubr.msk.bf16.vlgmr.msra.gmra.mrb[4].mxu1 %vm651_vm2, %v680_v45 }
 0x1b8   : > { %1762 = vmatpush3.bf16.xpose.msra.mxu1 %v769_v44  ;;  %1765 = vmatprep.mubr.msk.bf16.mxu1 %vm584_vm0, %v755_v46 }
 0x1b9   : > { %1833 = vmatprep.subr.msk.bf16.mxu1 %vm584_vm0, %v761_v47 }
 0x1c0   : > { %1764 = vmatpush3.bf16.xpose.msra.mxu1 %v772_v48 }
 0x1c7   : > { %1766 = vmatmul.mubr.msk.bf16.vlgmr.msra.gmra.mrb[8].mxu1 %vm584_vm0, %v757_v49 }
 0x28a   : > { %v2184_v50 = vpop.f32.mrb[4].mxu1 }
 0x28b   : > { %v2186_v51 = vpop.f32.mrb[5].mxu1 }
 0x28c   : > { %v1760_v52 = vpop.f32.mrb[6].mxu1 }
 0x28d   : > { %v2188_v53 = vpop.f32.mrb[7].mxu1 }
 0x29a   : > { %v1767_v54 = vpop.f32.mrb[8].mxu1 }
 0x29b   : > { %v824_v55 = vsel %vm647_vm1, %v1767_v54, -inf  ;;  %v808_v56 = vpop.f32.mrb[9].mxu1 }
 0x29c   : > { %v822_v57 = vsel %vm647_vm1, %v808_v56, -inf  ;;  %v1768_v58 = vpop.f32.mrb[10].mxu1  ;;  %v831_v59 = vsel %vm651_vm2, %v824_v55, -inf }
 0x29d   : > { %832 = vmax.xlane.f32.xlu0 %v831_v59  ;;  %v811_v60 = vpop.f32.mrb[11].mxu1  ;;  %v825_v61 = vsel %vm651_vm2, %v822_v57, -inf }
 0x29e   : > { %v823_v62 = vsel %vm647_vm1, %v811_v60, -inf  ;;  %826 = vmax.xlane.f32.xlu1 %v825_v61 }
 0x29f   : > { %v828_v63 = vsel %vm651_vm2, %v823_v62, -inf }
 0x2a1   : > { %829 = vmax.xlane.f32.xlu0 %v828_v63 }
 0x2af   : > { %856 = vrot.lane.b32.xlu1 %v2155_v28, %s2007_s21 }
 0x2b3   : > { %926 = vrot.lane.b32.xlu1 %v2114_v9, %s2008_s16 }
 0x2b7   : > { %854 = vrot.lane.b32.xlu0 %v2152_v27, %s2007_s21  ;;  %928 = vrot.lane.b32.xlu1 %v2116_v10, %s2008_s16 }
 0x2bb   : > { %922 = vrot.lane.b32.xlu0 %v2123_v12, %s2008_s16  ;;  %924 = vrot.lane.b32.xlu1 %v2131_v14, %s2008_s16 }
 0x2bf   : > { %1024 = vrot.lane.b32.xlu1 %v2155_v28, %s2008_s16 }
 0x32a   : > { %v833_v0 = vpop.xlane.xlu0 %832 }
 0x32b   : > { %v836_v1 = vsub.f32 %v824_v55, %v833_v0  ;;  %v827_v2 = vpop.xlane.xlu1 %826 }
 0x32c   : > { %v834_v3 = vsub.f32 %v822_v57, %v827_v2 }
 0x32d   : > { %v841_v4 = vmul.f32 1.442695, %v836_v1 }
 0x32e   : > { %v837_v5 = vmul.f32 1.442695, %v834_v3  ;;  %v830_v6 = vpop.xlane.xlu0 %829 }
 0x32f   : > { %v835_v7 = vsub.f32 %v823_v62, %v830_v6  ;;  %1925 = vpow2.f32 %v841_v4  ;;  %v857_v13 = vpop.permute.xlu1 %856 }
 0x330   : > { %1927 = vpow2.f32 %v837_v5  ;;  %v866_v15 = vsel %vm696_vm3, %v857_v13, 0 }
 0x331   : > { %v839_v8 = vmul.f32 1.442695, %v835_v7 }
 0x332   : > { %v855_v11 = vpop.permute.xlu0 %854 }
 0x333   : > { %1929 = vpow2.f32 %v839_v8  ;;  %1769 = vmatprep.subr.bf16.mxu0 %v855_v11  ;;  %v927_v17 = vpop.permute.xlu1 %926 }
 0x334   : > { %1770 = vmatpush3.bf16.msra.mxu0 %v855_v11  ;;  %v937_v22 = vsel %vm584_vm0, %v927_v17, 0 }
 0x335   : > { %1834 = vmatprep.subr.msk.bf16.mxu0 %vm696_vm3, %v857_v13 }
 0x336   : > { %v923_v24 = vpop.permute.xlu0 %922 }
 0x337   : > { %v929_v25 = vpop.permute.xlu1 %928 }
 0x338   : > { %1772 = vmatpush3.bf16.msra.mxu0 %v866_v15  ;;  %v940_v26 = vsel %vm584_vm0, %v929_v25, 0 }
 0x339   : > { %1835 = vmatprep.subr.msk.bf16.mxu0 %vm584_vm0, %v927_v17  ;;  %v2216_v18 = vpop.eup %1925 }
 0x33a   : > { %v2218_v19 = vpop.eup %1927  ;;  %v853_v23 = vpack.c.bf16 %v2216_v18, %v2216_v18 }
 0x33b   : > { %v925_v29 = vpop.permute.xlu1 %924 }
 0x33d   : > { %v2220_v20 = vpop.eup %1929 }
 0x33e   : > { %v852_v21 = vpack.c.bf16 %v2220_v20, %v2218_v19 }
 0x33f   : > { %v1025_v47 = vpop.permute.xlu1 %1024 }
 0x340   : > { %1773 = vmatprep.mubr.msk.bf16.mxu0 %vm651_vm2, %v852_v21 }
 0x341   : > { %1774 = vmatmul.mubr.msk.bf16.vlgmr.msra.gmra.mrb[0].mxu0 %vm651_vm2, %v853_v23 }
 0x342   : > { %1778 = vmatpush3.bf16.xpose.msra.mxu0 %v937_v22  ;;  %1781 = vmatprep.mubr.msk.bf16.mxu0 %vm584_vm0, %v923_v24 }
 0x343   : > { %1836 = vmatprep.subr.msk.bf16.mxu0 %vm584_vm0, %v929_v25 }
 0x34a   : > { %1780 = vmatpush3.bf16.xpose.msra.mxu0 %v940_v26 }
 0x351   : > { %1782 = vmatmul.mubr.msk.bf16.vlgmr.msra.gmra.mrb[4].mxu0 %vm584_vm0, %v925_v29  ;;  %v843_v29 = vsel %vm651_vm2, %v2218_v19, 0.0 }
 0x414   : > { %v2233_v30 = vpop.f32.mrb[0].mxu0 }
 0x415   : > { %v2235_v31 = vpop.f32.mrb[1].mxu0 }
 0x416   : > { %v1776_v32 = vpop.f32.mrb[2].mxu0 }
 0x417   : > { %v2237_v33 = vpop.f32.mrb[3].mxu0  ;;  %v846_v32 = vsel %vm651_vm2, %v2220_v20, 0.0 }
 0x424   : > { %v1783_v34 = vpop.f32.mrb[4].mxu0 }
 0x425   : > { %v992_v35 = vsel %vm647_vm1, %v1783_v34, -inf  ;;  %v976_v36 = vpop.f32.mrb[5].mxu0  ;;  %v849_v34 = vsel %vm651_vm2, %v2216_v18, 0.0 }
 0x426   : > { %v1784_v37 = vpop.f32.mrb[6].mxu0  ;;  %v999_v38 = vsel %vm651_vm2, %v992_v35, -inf  ;;  %v990_v39 = vsel %vm647_vm1, %v976_v36, -inf }
 0x427   : > { %1000 = vmax.xlane.f32.xlu0 %v999_v38  ;;  %v979_v43 = vpop.f32.mrb[7].mxu0  ;;  %v993_v46 = vsel %vm651_vm2, %v990_v39, -inf }
 0x428   : > { %v991_v44 = vsel %vm647_vm1, %v979_v43, -inf }
 0x429   : > { %v996_v45 = vsel %vm651_vm2, %v991_v44, -inf }
 0x42a   : > { %997 = vmax.xlane.f32.xlu1 %v996_v45 }
 0x42b   : > { %994 = vmax.xlane.f32.xlu0 %v993_v46 }
 0x43b   : > { %1094 = vrot.lane.b32.xlu1 %v2114_v9, %s2009_s17 }
 0x43f   : > { %1090 = vrot.lane.b32.xlu1 %v2123_v12, %s2009_s17 }
 0x441   : > { %1022 = vrot.lane.b32.xlu0 %v2152_v27, %s2008_s16 }
 0x445   : > { %1096 = vrot.lane.b32.xlu0 %v2116_v10, %s2009_s17 }
 0x449   : > { %1092 = vrot.lane.b32.xlu0 %v2131_v14, %s2009_s17  ;;  %v1034_v14 = vsel %vm696_vm3, %v1025_v47, 0 }
 0x4b4   : > { %v1001_v48 = vpop.xlane.xlu0 %1000 }
 0x4b5   : > { %v1004_v49 = vsub.f32 %v992_v35, %v1001_v48 }
 0x4b7   : > { %v1009_v52 = vmul.f32 1.442695, %v1004_v49  ;;  %v998_v54 = vpop.xlane.xlu1 %997 }
 0x4b8   : > { %v1003_v55 = vsub.f32 %v991_v44, %v998_v54  ;;  %v995_v56 = vpop.xlane.xlu0 %994 }
 0x4b9   : > { %v1002_v9 = vsub.f32 %v990_v39, %v995_v56  ;;  %1931 = vpow2.f32 %v1009_v52 }
 0x4ba   : > { %v1007_v57 = vmul.f32 1.442695, %v1003_v55 }
 0x4bb   : > { %v1005_v12 = vmul.f32 1.442695, %v1002_v9  ;;  %v1095_v10 = vpop.permute.xlu1 %1094 }
 0x4bc   : > { %1933 = vpow2.f32 %v1007_v57  ;;  %v1023_v58 = vpop.permute.xlu0 %1022  ;;  %v1105_v63 = vsel %vm584_vm0, %v1095_v10, 0  ;;  %v670_v57 = vsel %vm651_vm2, %v2169_v41, 0.0 }
 0x4bd   : > { %1935 = vpow2.f32 %v1005_v12  ;;  %1785 = vmatprep.subr.bf16.mxu1 %v1023_v58  ;;  %v673_v12 = vsel %vm651_vm2, %v2171_v42, 0.0 }
 0x4be   : > { %1786 = vmatpush3.bf16.msra.mxu1 %v1023_v58  ;;  %v676_v58 = vsel %vm651_vm2, %v2167_v40, 0.0 }
 0x4bf   : > { %1837 = vmatprep.subr.msk.bf16.mxu1 %vm696_vm3, %v1025_v47  ;;  %v1091_v1 = vpop.permute.xlu1 %1090 }
 0x4c0   : > { %v1097_v2 = vpop.permute.xlu0 %1096 }
 0x4c1   : > { %v1108_v3 = vsel %vm584_vm0, %v1097_v2, 0 }
 0x4c2   : > { %1788 = vmatpush3.bf16.msra.mxu1 %v1034_v14 }
 0x4c3   : > { %1838 = vmatprep.subr.msk.bf16.mxu1 %vm584_vm0, %v1095_v10  ;;  %v1932_v59 = vpop.eup %1931 }
 0x4c4   : > { %v1021_v0 = vpack.c.bf16 %v1932_v59, %v1932_v59  ;;  %v1093_v4 = vpop.permute.xlu0 %1092 }
 0x4c6   : > { %v1934_v60 = vpop.eup %1933 }
 0x4c7   : > { %v1936_v61 = vpop.eup %1935 }
 0x4c8   : > { %v1020_v62 = vpack.c.bf16 %v1934_v60, %v1936_v61  ;;  %v1011_v16 = vsel %vm651_vm2, %v1936_v61, 0.0 }
 0x4ca   : > { %1789 = vmatprep.mubr.msk.bf16.mxu1 %vm651_vm2, %v1020_v62 }
 0x4cb   : > { %1790 = vmatmul.mubr.msk.bf16.vlgmr.msra.gmra.mrb[12].mxu1 %vm651_vm2, %v1021_v0 }
 0x4cc   : > { %1794 = vmatpush3.bf16.xpose.msra.mxu1 %v1105_v63  ;;  %1797 = vmatprep.mubr.msk.bf16.mxu1 %vm584_vm0, %v1091_v1 }
 0x4cd   : > { %1839 = vmatprep.subr.msk.bf16.mxu1 %vm584_vm0, %v1097_v2 }
 0x4d4   : > { %1796 = vmatpush3.bf16.xpose.msra.mxu1 %v1108_v3 }
 0x4db   : > { %1798 = vmatmul.mubr.msk.bf16.vlgmr.msra.gmra.mrb[16].mxu1 %vm584_vm0, %v1093_v4 }
 0x59e   : > { %v2268_v5 = vpop.f32.mrb[12].mxu1 }
 0x59f   : > { %v2270_v6 = vpop.f32.mrb[13].mxu1 }
 0x5a0   : > { %v1792_v7 = vpop.f32.mrb[14].mxu1 }
 0x5a1   : > { %v2272_v8 = vpop.f32.mrb[15].mxu1 }
 0x5ae   : > { %v1799_v11 = vpop.f32.mrb[16].mxu1 }
 0x5af   : > { %v1160_v13 = vsel %vm647_vm1, %v1799_v11, -inf  ;;  %v1144_v15 = vpop.f32.mrb[17].mxu1 }
 0x5b0   : > { %v1158_v17 = vsel %vm647_vm1, %v1144_v15, -inf  ;;  %v1800_v21 = vpop.f32.mrb[18].mxu1  ;;  %v1167_v22 = vsel %vm651_vm2, %v1160_v13, -inf }
 0x5b1   : > { %1168 = vmax.xlane.f32.xlu0 %v1167_v22  ;;  %v1147_v23 = vpop.f32.mrb[19].mxu1  ;;  %v1161_v24 = vsel %vm651_vm2, %v1158_v17, -inf }
 0x5b2   : > { %v1159_v25 = vsel %vm647_vm1, %v1147_v23, -inf  ;;  %1162 = vmax.xlane.f32.xlu1 %v1161_v24  ;;  %v1917_v24 = vld [vmem:[%s2380_s3 + $0x30] sm:$0xff]  }
 0x5b3   : > { %v1164_v26 = vsel %vm651_vm2, %v1159_v25, -inf }
 0x5b5   : > { %1165 = vmax.xlane.f32.xlu0 %v1164_v26 }
 0x5c3   : > { %1192 = vrot.lane.b32.xlu1 %v2155_v28, %s2009_s17  ;;  %v1017_v28 = vsel %vm651_vm2, %v1932_v59, 0.0 }
 0x5cb   : > { %1190 = vrot.lane.b32.xlu0 %v2152_v27, %s2009_s17  ;;  %v1014_v27 = vsel %vm651_vm2, %v1934_v60, 0.0 }
 0x5e7   : > { %844 = vadd.xlane.f32.xlu1 %v843_v29 }
 0x5ea   : > { %847 = vadd.xlane.f32.xlu0 %v846_v32 }
 0x5eb   : > { %1012 = vadd.xlane.f32.xlu1 %v1011_v16 }
 0x5ee   : > { %850 = vadd.xlane.f32.xlu0 %v849_v34 }
 0x5ef   : > { %1018 = vadd.xlane.f32.xlu1 %v1017_v28 }
 0x5f2   : > { %1015 = vadd.xlane.f32.xlu0 %v1014_v27 }
 0x63e   : > { %v1169_v35 = vpop.xlane.xlu0 %1168 }
 0x63f   : > { %v1172_v19 = vsub.f32 %v1160_v13, %v1169_v35  ;;  %v1163_v36 = vpop.xlane.xlu1 %1162 }
 0x640   : > { %v1170_v37 = vsub.f32 %v1158_v17, %v1163_v36  ;;  %v1916_v17 = vld [vmem:[%s2380_s3 + $0x28] sm:$0xff]  }
 0x641   : > { %v1177_v38 = vmul.f32 1.442695, %v1172_v19 }
 0x642   : > { %v1173_v20 = vmul.f32 1.442695, %v1170_v37  ;;  %v1166_v39 = vpop.xlane.xlu0 %1165 }
 0x643   : > { %v1171_v43 = vsub.f32 %v1159_v25, %v1166_v39  ;;  %v1193_v18 = vpop.permute.xlu1 %1192  ;;  %v1918_v25 = vld [vmem:[%s2380_s3 + $0x38] sm:$0xff]  }
 0x644   : > { %1937 = vpow2.f32 %v1173_v20  ;;  %v1202_v46 = vsel %vm696_vm3, %v1193_v18, 0 }
 0x645   : > { %v1175_v44 = vmul.f32 1.442695, %v1171_v43  ;;  %1939 = vpow2.f32 %v1177_v38 }
 0x646   : > { %v1191_v45 = vpop.permute.xlu0 %1190 }
 0x647   : > { %1941 = vpow2.f32 %v1175_v44  ;;  %1801 = vmatprep.subr.bf16.mxu0 %v1191_v45 }
 0x648   : > { %1802 = vmatpush3.bf16.msra.mxu0 %v1191_v45 }
 0x649   : > { %1840 = vmatprep.subr.msk.bf16.mxu0 %vm696_vm3, %v1193_v18 }
 0x64c   : > { %1804 = vmatpush3.bf16.msra.mxu0 %v1202_v46 }
 0x64e   : > { %v1938_v47 = vpop.eup %1937 }
 0x64f   : > { %v1179_v48 = vsel %vm651_vm2, %v1938_v47, 0.0  ;;  %v1940_v49 = vpop.eup %1939 }
 0x650   : > { %1180 = vadd.xlane.f32.xlu0 %v1179_v48  ;;  %v1185_v56 = vsel %vm651_vm2, %v1940_v49, 0.0  ;;  %v1189_v9 = vpack.c.bf16 %v1940_v49, %v1940_v49 }
 0x651   : > { %v1942_v52 = vpop.eup %1941 }
 0x652   : > { %v1182_v54 = vsel %vm651_vm2, %v1942_v52, 0.0  ;;  %v1188_v55 = vpack.c.bf16 %v1942_v52, %v1938_v47 }
 0x653   : > { %1183 = vadd.xlane.f32.xlu1 %v1182_v54 }
 0x654   : > { %1186 = vadd.xlane.f32.xlu0 %v1185_v56  ;;  %1805 = vmatprep.mubr.msk.bf16.mxu0 %vm651_vm2, %v1188_v55 }
 0x655   : > { %1806 = vmatmul.mubr.msk.bf16.vlgmr.msra.gmra.mrb[8].mxu0 %vm651_vm2, %v1189_v9 }
 0x657   : > { %671 = vadd.xlane.f32.xlu1 %v670_v57 }
 0x658   : > { %674 = vadd.xlane.f32.xlu0 %v673_v12 }
 0x65b   : > { %677 = vadd.xlane.f32.xlu1 %v676_v58 }
 0x674   : > { %v845_v10 = vpop.xlane.xlu1 %844 }
 0x675   : > { %1943 = vrcp.f32 %v845_v10 }
 0x677   : > { %v848_v14 = vpop.xlane.xlu0 %847 }
 0x678   : > { %1945 = vrcp.f32 %v848_v14  ;;  %v1013_v59 = vpop.xlane.xlu1 %1012 }
 0x67b   : > { %v851_v60 = vpop.xlane.xlu0 %850 }
 0x67c   : > { %1947 = vrcp.f32 %v851_v60  ;;  %v1019_v41 = vpop.xlane.xlu1 %1018 }
 0x67d   : > { %1949 = vrcp.f32 %v1013_v59 }
 0x67f   : > { %v1016_v61 = vpop.xlane.xlu0 %1015  ;;  %v1944_v62 = vpop.eup %1943 }
 0x680   : > { %1951 = vrcp.f32 %v1016_v61  ;;  %v919_v42 = vmul.f32 %v1944_v62, %v2235_v31 }
 0x681   : > { %1953 = vrcp.f32 %v1019_v41 }
 0x682   : > { %v1946_v63 = vpop.eup %1945 }
 0x683   : > { %v920_v0 = vmul.f32 %v1946_v63, %v2237_v33  ;;  %v1912_v33 = vld [vmem:[%s2380_s3 + $0x8] sm:$0xff]  }
 0x685   : > { %v1890_v40 = vpack.i.bf16 %v920_v0, %v919_v42 }
 0x686   : > { %v1948_v1 = vpop.eup %1947 }
 0x687   : > { %1891 = vrot.lane.b32.xlu0 %v1890_v40, %s2009_s17  ;;  %v921_v2 = vmul.f32 %v1948_v1, %v2233_v30  ;;  %v1950_v3 = vpop.eup %1949  ;;  %v1911_v30 = vld [vmem:[%s2380_s3] sm:$0xff]  }
 0x688   : > { %v1087_v7 = vmul.f32 %v1950_v3, %v2270_v6  ;;  %1809 = vmatprep.subr.bf16.mxu0 %v1911_v30  ;;  %v1913_v6 = vld [vmem:[%s2380_s3 + $0x10] sm:$0xff]   ;;  %v1685_v1 = vld [vmem:[%s2381_s4] ss:$0 sm:$0xff] }
 0x689   : > { %1265 = vrot.lane.b32.xlu1 %v921_v2, %s2009_s17  ;;  %1810 = vmatpush3.bf16.msra.mxu0 %v1911_v30 }
 0x68a   : > { %v1952_v4 = vpop.eup %1951  ;;  %1811 = vmatprep.subr.bf16.mxu0 %v1912_v33 }
 0x68b   : > { %v1088_v11 = vmul.f32 %v1952_v4, %v2272_v8  ;;  %v1954_v15 = vpop.eup %1953  ;;  %v1915_v8 = vld [vmem:[%s2380_s3 + $0x20] sm:$0xff]  }
 0x68c   : > { %v1089_v31 = vmul.f32 %v1954_v15, %v2268_v5  ;;  %v1914_v5 = vld [vmem:[%s2380_s3 + $0x18] sm:$0xff]  }
 0x68d   : > { %v1895_v13 = vpack.i.bf16 %v1088_v11, %v1087_v7  ;;  %1812 = vmatpush3.bf16.msra.mxu0 %v1912_v33 }
 0x68e   : > { %1813 = vmatprep.subr.bf16.mxu0 %v1913_v6 }
 0x68f   : > { %1896 = vrot.lane.b32.xlu1 %v1895_v13, %s2008_s16 }
 0x691   : > { %1814 = vmatpush3.bf16.msra.mxu0 %v1913_v6 }
 0x692   : > { %1815 = vmatprep.subr.bf16.mxu0 %v1914_v5 }
 0x693   : > { %1277 = vrot.lane.b32.xlu1 %v1089_v31, %s2008_s16 }
 0x695   : > { %1816 = vmatpush3.bf16.msra.mxu0 %v1914_v5 }
 0x696   : > { %1817 = vmatprep.subr.bf16.mxu0 %v1915_v8 }
 0x699   : > { %1818 = vmatpush3.bf16.msra.mxu0 %v1915_v8 }
 0x69a   : > { %1819 = vmatprep.subr.bf16.mxu0 %v1916_v17 }
 0x69d   : > { %1820 = vmatpush3.bf16.msra.mxu0 %v1916_v17 }
 0x69e   : > { %1821 = vmatprep.subr.bf16.mxu0 %v1917_v24 }
 0x6a1   : > { %1822 = vmatpush3.bf16.msra.mxu0 %v1917_v24 }
 0x6a2   : > { %1823 = vmatprep.subr.bf16.mxu0 %v1918_v25 }
 0x6a5   : > { %1824 = vmatpush3.bf16.msra.mxu0 %v1918_v25 }
 0x6dd   : > { %v1181_v21 = vpop.xlane.xlu0 %1180 }
 0x6e0   : > { %v1184_v23 = vpop.xlane.xlu1 %1183 }
 0x6e1   : > { %v1187_v22 = vpop.xlane.xlu0 %1186 }
 0x6e2   : > { %1955 = vrcp.f32 %v1187_v22 }
 0x6e3   : > { %1957 = vrcp.f32 %v1181_v21 }
 0x6e4   : > { %1959 = vrcp.f32 %v1184_v23  ;;  %v672_v38 = vpop.xlane.xlu1 %671 }
 0x6e5   : > { %v675_v20 = vpop.xlane.xlu0 %674 }
 0x6e6   : > { %1961 = vrcp.f32 %v675_v20 }
 0x6e8   : > { %v678_v39 = vpop.xlane.xlu1 %677 }
 0x6e9   : > { %1963 = vrcp.f32 %v678_v39 }
 0x6ea   : > { %1965 = vrcp.f32 %v672_v38 }
 0x6ec   : > { %v1956_v26 = vpop.eup %1955 }
 0x6ed   : > { %v1958_v34 = vpop.eup %1957 }
 0x6ee   : > { %v1960_v27 = vpop.eup %1959 }
 0x6f0   : > { %v1962_v18 = vpop.eup %1961 }
 0x6f1   : > { %v752_v54 = vmul.f32 %v1962_v18, %v2188_v53 }
 0x6f3   : > { %v1964_v46 = vpop.eup %1963 }
 0x6f4   : > { %v1966_v48 = vpop.eup %1965  ;;  %v753_v55 = vmul.f32 %v1964_v46, %v2184_v50 }
 0x6f5   : > { %v751_v57 = vmul.f32 %v1966_v48, %v2186_v51 }
 0x6f9   : > { %v1892_v45 = vpop.permute.xlu0 %1891 }
 0x6fa   : > { %v1894_v49 = vunpack.i.h.bf16 %v1892_v45  ;;  %v1893_v52 = vunpack.i.l.bf16 %v1892_v45 }
 0x6fb   : > { %v1266_v43 = vpop.permute.xlu1 %1265 }
 0x6fc   : > { %v1295_v58 = vsel %vm584_vm0, %v752_v54, %v1894_v49  ;;  %v1296_v10 = vsel %vm584_vm0, %v753_v55, %v1266_v43  ;;  %v1294_v59 = vsel %vm584_vm0, %v751_v57, %v1893_v52 }
 0x701   : > { %v1897_v44 = vpop.permute.xlu1 %1896 }
 0x702   : > { %v1899_v56 = vunpack.i.h.bf16 %v1897_v44  ;;  %v1898_v9 = vunpack.i.l.bf16 %v1897_v44 }
 0x704   : > { %v1298_v50 = vsel %vm1297_vm4, %v1294_v59, %v1898_v9  ;;  %v1299_v62 = vsel %vm1297_vm4, %v1295_v58, %v1899_v56 }
 0x705   : > { %v1278_v47 = vpop.permute.xlu1 %1277 }
 0x706   : > { %v1300_v60 = vsel %vm1297_vm4, %v1296_v10, %v1278_v47 }
 0x728   : > { %v1807_v29 = vpop.f32.mrb[8].mxu0 }
 0x729   : > { %v1257_v32 = vmul.f32 %v1956_v26, %v1807_v29  ;;  %v1238_v16 = vpop.f32.mrb[9].mxu0 }
 0x72a   : > { %v1808_v28 = vpop.f32.mrb[10].mxu0  ;;  %v1255_v19 = vmul.f32 %v1958_v34, %v1238_v16 }
 0x72b   : > { %v1241_v35 = vpop.f32.mrb[11].mxu0  ;;  %1289 = vrot.lane.b32.xlu1 %v1257_v32, %s2007_s21 }
 0x72c   : > { %v1256_v36 = vmul.f32 %v1960_v27, %v1241_v35 }
 0x72e   : > { %v1900_v37 = vpack.i.bf16 %v1256_v36, %v1255_v19 }
 0x730   : > { %1901 = vrot.lane.b32.xlu0 %v1900_v37, %s2007_s21  ;;  %s1846_s21 = smul.u32 12, %s2392_s23 }
 0x732   : > { %s539_s19 = scalar_lea.vmem %s2382_s5, %s1846_s21  ;;  %s549_s7 = scalar_lea.vmem %s2383_s6, %s1846_s21 }
 0x733   : > { %v1446_v40 = vld [vmem:[%s539_s19 + $0x8] sm:$0xf]  ;;  %v1695_v3 = vld [vmem:[%s539_s19] sm:$0xff]  }
 0x734   : > { %v1449_v2 = vunpack.c.l.bf16 %v1446_v40  ;;  %v1696_v15 = vunpack.c.l.bf16 %v1695_v3  ;;  %v1697_v30 = vunpack.c.h.bf16 %v1695_v3 }
 0x79d   : > { %v1290_v12 = vpop.permute.xlu1 %1289 }
 0x79e   : > { %v1304_v41 = vsel %vm1301_vm5, %v1300_v60, %v1290_v12 }
 0x79f   : > { %v1309_v0 = vpack.c.bf16 %v1304_v41, %v1304_v41 }
 0x7a2   : > { %v1902_v14 = vpop.permute.xlu0 %1901 }
 0x7a3   : > { %v1904_v53 = vunpack.i.h.bf16 %v1902_v14  ;;  %v1903_v61 = vunpack.i.l.bf16 %v1902_v14 }
 0x7a5   : > { %v1302_v63 = vsel %vm1301_vm5, %v1298_v50, %v1903_v61  ;;  %v1303_v51 = vsel %vm1301_vm5, %v1299_v62, %v1904_v53 }
 0x7a6   : > { %v1308_v42 = vpack.c.bf16 %v1303_v51, %v1302_v63 }
 0x7a8   : > { %1825 = vmatprep.mubr.bf16.mxu0 %v1308_v42 }
 0x7a9   : > { %1826 = vmatmul.mubr.bf16.vlgmr.msra.gmra.mrb[12].mxu0 %v1309_v0 }
 0x87c   : > { %v1827_v4 = vpop.f32.mrb[12].mxu0 }
 0x87d   : > { %v1443_v7 = vadd.f32 %v1827_v4, %v1685_v1  ;;  %v1408_v11 = vpop.f32.mrb[13].mxu0 }
 0x87e   : > { %v1441_v13 = vadd.f32 %v1685_v1, %v1408_v11  ;;  %v1828_v31 = vpop.f32.mrb[14].mxu0 }
 0x87f   : > { %v1452_v33 = vadd.f32 %v1449_v2, %v1443_v7  ;;  %v1411_v6 = vpop.f32.mrb[15].mxu0 }
 0x880   : > { %v1442_v5 = vadd.f32 %v1685_v1, %v1411_v6  ;;  %v1450_v17 = vadd.f32 %v1696_v15, %v1441_v13 }
 0x881   : > { %v1693_v8 = vpack.c.bf16 %v1452_v33, %v1452_v33 }
 0x882   : > { %v1451_v21 = vadd.f32 %v1697_v30, %v1442_v5 }
 0x883   : > { %1468 = vst [vmem:[%s549_s7 + $0x8] sm:$0xf] %v1693_v8 }
 0x884   : > { %v1701_v22 = vpack.c.bf16 %v1451_v21, %v1450_v17 }
 0x886   : > { %1702 = vst [vmem:[%s549_s7] sm:$0xff] %v1701_v22  }
 0x887 PF: > { %s16_s25 = sadd.s32 1, %s2005_s25   ;;  %s2385_s21 = smov %s1993_s22 }
 0x888   : > { %p13_p10 = scmp.ge.s32.totalorder %s16_s25, 4   ;;  %s2386_s22 = smov %s2084_s30 }
 0x889   : > { %s2387_s23 = smov %s2001_s24  ;;  %s2388_s24 = smov %s2390_s26 }
 0x88a   :  { %15 = sbr.rel (!%p13_p10) target bundleno = 3 (0x3), region = 232 }

// kernel: _lambda_.13
= control target key start
LH: loop header
LB: loop body
LE: loop exit
PB: predicated region body
PF: predicated region fallthrough
CT: control target
= control target key end

     0   :  { %v585_v48 = vmov 0   ;;  %s830_s0 = inlined_call_operand.vmem [shape: bf16[48,128], index: 0, kind: input, shape index: {}]   ;;  %s831_s3 = inlined_call_operand.vmem [shape: bf16[128,256], index: 3, kind: input, shape index: {}]   ;;  %s832_s1 = inlined_call_operand.vmem [shape: f32[1,128], index: 1, kind: input, shape index: {}]   ;;  %s833_s2 = inlined_call_operand.vmem [shape: f32[1,128], index: 2, kind: input, shape index: {}]   ;;  %s834_s4 = inlined_call_operand.vmem [shape: f32[1,256], index: 4, kind: input, shape index: {}]   ;;  %s835_s5 = inlined_call_operand.vmem [shape: bf16[48,256], index: 5, kind: output, shape index: {}]  }
   0x1   :  { %v506_v0 = vld [vmem:[%s830_s0 + $0x8] sm:$0xff]   ;;  %v495_v1 = vld [vmem:[%s830_s0] sm:$0xff]   ;;  %v507_v6 = vld [vmem:[%s830_s0 + $0x10] sm:$0xff]   ;;  %289 = vmatprep.mubr.bf16.mxu1 %v585_v48  ;;  %279 = vmatprep.mubr.bf16.mxu0 %v585_v48 }
   0x2   :  { %v500_v2 = vunpack.c.l.bf16 %v506_v0  ;;  %v496_v3 = vunpack.c.l.bf16 %v495_v1  ;;  %v501_v4 = vunpack.c.h.bf16 %v506_v0  ;;  %v497_v5 = vunpack.c.h.bf16 %v495_v1  ;;  %v525_v9 = vld [vmem:[%s831_s3 + $0x4] ss:$8 sps:$4 sm:$0xff]   ;;  %v527_v10 = vld [vmem:[%s831_s3] ss:$8 sps:$4 sm:$0xff]   ;;  %v528_v11 = vld [vmem:[%s831_s3 + $0x14] ss:$8 sps:$4 sm:$0xff]  }
   0x3   :  { %v504_v7 = vunpack.c.l.bf16 %v507_v6  ;;  %v505_v8 = vunpack.c.h.bf16 %v507_v6  ;;  %508 = vmatprep.subr.bf16.mxu1 %v525_v9  ;;  %247 = vmatprep.subr.bf16.mxu0 %v525_v9  ;;  %v530_v36 = vld [vmem:[%s831_s3 + $0x10] ss:$8 sps:$4 sm:$0xff]   ;;  %v531_v37 = vld [vmem:[%s831_s3 + $0x24] ss:$8 sps:$4 sm:$0xff]   ;;  %v533_v38 = vld [vmem:[%s831_s3 + $0x20] ss:$8 sps:$4 sm:$0xff]  }
   0x4   :  { %41 = vadd.xlane.f32.xlu0 %v500_v2  ;;  %37 = vadd.xlane.f32.xlu1 %v496_v3  ;;  %v534_v39 = vld [vmem:[%s831_s3 + $0x34] ss:$8 sps:$4 sm:$0xff]   ;;  %v536_v40 = vld [vmem:[%s831_s3 + $0x30] ss:$8 sps:$4 sm:$0xff]   ;;  %v537_v41 = vld [vmem:[%s831_s3 + $0x44] ss:$8 sps:$4 sm:$0xff]  }
   0x5   :  { %516 = vmatpush1.bf16.msra.mxu1 %v527_v10  ;;  %248 = vmatpush1.bf16.msra.mxu0 %v527_v10  ;;  %v539_v42 = vld [vmem:[%s831_s3 + $0x40] ss:$8 sps:$4 sm:$0xff]   ;;  %v540_v43 = vld [vmem:[%s831_s3 + $0x54] ss:$8 sps:$4 sm:$0xff]   ;;  %v542_v44 = vld [vmem:[%s831_s3 + $0x50] ss:$8 sps:$4 sm:$0xff]  }
   0x6   :  { %509 = vmatprep.subr.bf16.mxu1 %v528_v11  ;;  %249 = vmatprep.subr.bf16.mxu0 %v528_v11  ;;  %v543_v45 = vld [vmem:[%s831_s3 + $0x64] ss:$8 sps:$4 sm:$0xff]   ;;  %v545_v46 = vld [vmem:[%s831_s3 + $0x60] ss:$8 sps:$4 sm:$0xff]   ;;  %v546_v47 = vld [vmem:[%s831_s3 + $0x74] ss:$8 sps:$4 sm:$0xff]  }
   0x7   :  { %v548_v49 = vld [vmem:[%s831_s3 + $0x70] ss:$8 sps:$4 sm:$0xff]   ;;  %v464_v6 = vld [vmem:[%s832_s1] ss:$0 sm:$0xff] }
   0x8   :  { %43 = vadd.xlane.f32.xlu0 %v501_v4  ;;  %39 = vadd.xlane.f32.xlu1 %v497_v5 }
   0x9   :  { %517 = vmatpush1.bf16.msra.mxu1 %v530_v36  ;;  %250 = vmatpush1.bf16.msra.mxu0 %v530_v36 }
   0xa   :  { %510 = vmatprep.subr.bf16.mxu1 %v531_v37  ;;  %251 = vmatprep.subr.bf16.mxu0 %v531_v37  ;;  %v155_v37 = vld [vmem:[%s834_s4] sm:$0x3] }
   0xc   :  { %45 = vadd.xlane.f32.xlu0 %v504_v7  ;;  %47 = vadd.xlane.f32.xlu1 %v505_v8 }
   0xd   :  { %518 = vmatpush1.bf16.msra.mxu1 %v533_v38  ;;  %252 = vmatpush1.bf16.msra.mxu0 %v533_v38 }
   0xe   :  { %511 = vmatprep.subr.bf16.mxu1 %v534_v39  ;;  %253 = vmatprep.subr.bf16.mxu0 %v534_v39 }
  0x11   :  { %519 = vmatpush1.bf16.msra.mxu1 %v536_v40  ;;  %254 = vmatpush1.bf16.msra.mxu0 %v536_v40 }
  0x12   :  { %512 = vmatprep.subr.bf16.mxu1 %v537_v41  ;;  %255 = vmatprep.subr.bf16.mxu0 %v537_v41 }
  0x15   :  { %520 = vmatpush1.bf16.msra.mxu1 %v539_v42  ;;  %256 = vmatpush1.bf16.msra.mxu0 %v539_v42 }
  0x16   :  { %513 = vmatprep.subr.bf16.mxu1 %v540_v43  ;;  %257 = vmatprep.subr.bf16.mxu0 %v540_v43 }
  0x19   :  { %521 = vmatpush1.bf16.msra.mxu1 %v542_v44  ;;  %258 = vmatpush1.bf16.msra.mxu0 %v542_v44 }
  0x1a   :  { %514 = vmatprep.subr.bf16.mxu1 %v543_v45  ;;  %259 = vmatprep.subr.bf16.mxu0 %v543_v45 }
  0x1d   :  { %522 = vmatpush1.bf16.msra.mxu1 %v545_v46  ;;  %260 = vmatpush1.bf16.msra.mxu0 %v545_v46 }
  0x1e   :  { %515 = vmatprep.subr.bf16.mxu1 %v546_v47  ;;  %261 = vmatprep.subr.bf16.mxu0 %v546_v47 }
  0x21   :  { %523 = vmatpush1.bf16.msra.mxu1 %v548_v49  ;;  %262 = vmatpush1.bf16.msra.mxu0 %v548_v49 }
  0x91   :  { %v42_v12 = vpop.xlane.xlu0 %41  ;;  %v38_v13 = vpop.xlane.xlu1 %37 }
  0x92   :  { %v52_v14 = vmul.f32 0.0078125, %v42_v12  ;;  %v50_v15 = vmul.f32 0.0078125, %v38_v13  ;;  %v465_v12 = vld [vmem:[%s833_s2] ss:$0 sm:$0xff] }
  0x94   :  { %v634_v16 = vsub.f32 %v500_v2, %v52_v14  ;;  %v636_v17 = vsub.f32 %v496_v3, %v50_v15 }
  0x95   :  { %v44_v18 = vpop.xlane.xlu0 %43  ;;  %v40_v19 = vpop.xlane.xlu1 %39 }
  0x96   :  { %v53_v20 = vmul.f32 0.0078125, %v44_v18  ;;  %v64_v21 = vmul.f32 %v634_v16, %v634_v16  ;;  %v51_v22 = vmul.f32 0.0078125, %v40_v19  ;;  %v62_v25 = vmul.f32 %v636_v17, %v636_v17 }
  0x98   :  { %v640_v23 = vsub.f32 %v501_v4, %v53_v20  ;;  %72 = vadd.xlane.f32.xlu0 %v64_v21  ;;  %v642_v24 = vsub.f32 %v497_v5, %v51_v22 }
  0x99   :  { %v46_v26 = vpop.xlane.xlu0 %45  ;;  %v48_v27 = vpop.xlane.xlu1 %47 }
  0x9a   :  { %v54_v28 = vmul.f32 0.0078125, %v46_v26  ;;  %v65_v29 = vmul.f32 %v640_v23, %v640_v23  ;;  %v55_v30 = vmul.f32 0.0078125, %v48_v27  ;;  %v63_v33 = vmul.f32 %v642_v24, %v642_v24 }
  0x9c   :  { %v648_v31 = vsub.f32 %v504_v7, %v54_v28  ;;  %74 = vadd.xlane.f32.xlu1 %v65_v29  ;;  %68 = vadd.xlane.f32.xlu0 %v62_v25  ;;  %v650_v32 = vsub.f32 %v505_v8, %v55_v30 }
  0x9e   :  { %v66_v34 = vmul.f32 %v648_v31, %v648_v31  ;;  %v67_v35 = vmul.f32 %v650_v32, %v650_v32 }
  0xa0   :  { %76 = vadd.xlane.f32.xlu0 %v66_v34  ;;  %70 = vadd.xlane.f32.xlu1 %v63_v33 }
  0xa4   :  { %78 = vadd.xlane.f32.xlu1 %v67_v35  ;;  %v157_v35 = vlaneseq }
 0x125   :  { %v73_v50 = vpop.xlane.xlu0 %72 }
 0x126   :  { %v82_v51 = vmul.f32 0.0078125, %v73_v50 }
 0x128   :  { %v88_v52 = vadd.f32 1e-06, %v82_v51 }
 0x129   :  { %v69_v53 = vpop.xlane.xlu0 %68  ;;  %v75_v54 = vpop.xlane.xlu1 %74 }
 0x12a   :  { %549 = vrsqrt.f32 %v88_v52  ;;  %v80_v55 = vmul.f32 0.0078125, %v69_v53  ;;  %v83_v56 = vmul.f32 0.0078125, %v75_v54 }
 0x12c   :  { %v86_v57 = vadd.f32 1e-06, %v80_v55  ;;  %v89_v58 = vadd.f32 1e-06, %v83_v56 }
 0x12d   :  { %v77_v59 = vpop.xlane.xlu0 %76  ;;  %v71_v60 = vpop.xlane.xlu1 %70 }
 0x12e   :  { %551 = vrsqrt.f32 %v86_v57  ;;  %v84_v61 = vmul.f32 0.0078125, %v77_v59  ;;  %v81_v62 = vmul.f32 0.0078125, %v71_v60 }
 0x12f   :  { %553 = vrsqrt.f32 %v89_v58 }
 0x130   :  { %v90_v63 = vadd.f32 1e-06, %v84_v61  ;;  %v87_v0 = vadd.f32 1e-06, %v81_v62 }
 0x131   :  { %v79_v1 = vpop.xlane.xlu1 %78 }
 0x132   :  { %555 = vrsqrt.f32 %v90_v63  ;;  %v85_v2 = vmul.f32 0.0078125, %v79_v1 }
 0x133   :  { %557 = vrsqrt.f32 %v87_v0 }
 0x134   :  { %v550_v3 = vpop.eup %549  ;;  %v91_v4 = vadd.f32 1e-06, %v85_v2 }
 0x135   :  { %v100_v5 = vmul.f32 %v550_v3, %v634_v16 }
 0x136   :  { %559 = vrsqrt.f32 %v91_v4 }
 0x137   :  { %v113_v10 = vmul.f32 %v464_v6, %v100_v5 }
 0x138   :  { %v552_v7 = vpop.eup %551 }
 0x139   :  { %v554_v8 = vpop.eup %553  ;;  %v98_v11 = vmul.f32 %v552_v7, %v636_v17  ;;  %v126_v18 = vadd.f32 %v465_v12, %v113_v10 }
 0x13a   :  { %v101_v9 = vmul.f32 %v554_v8, %v640_v23 }
 0x13b   :  { %v111_v21 = vmul.f32 %v464_v6, %v98_v11 }
 0x13c   :  { %v556_v13 = vpop.eup %555  ;;  %v114_v14 = vmul.f32 %v464_v6, %v101_v9 }
 0x13d   :  { %v558_v15 = vpop.eup %557  ;;  %v102_v16 = vmul.f32 %v556_v13, %v648_v31  ;;  %v124_v27 = vadd.f32 %v465_v12, %v111_v21 }
 0x13e   :  { %v127_v19 = vadd.f32 %v465_v12, %v114_v14  ;;  %v99_v20 = vmul.f32 %v558_v15, %v642_v24  ;;  %v158_v24 = vshrl.u32 %v157_v35, 7 }
 0x13f   :  { %v115_v17 = vmul.f32 %v464_v6, %v102_v16 }
 0x140   :  { %v560_v22 = vpop.eup %559  ;;  %v131_v25 = vpack.c.bf16 %v127_v19, %v126_v18  ;;  %v112_v23 = vmul.f32 %v464_v6, %v99_v20  ;;  %v159_v36 = vsub.s32 0, %v158_v24 }
 0x141   :  { %v103_v26 = vmul.f32 %v560_v22, %v650_v32  ;;  %v128_v33 = vadd.f32 %v465_v12, %v115_v17  ;;  %v163_v32 = vsub.s32 1, %v158_v24 }
 0x142   :  { %290 = vmatmul.mubr.bf16.vlgmr.msra.gmra.mrb[0].mxu1 %v131_v25  ;;  %v125_v28 = vadd.f32 %v465_v12, %v112_v23  ;;  %v712_v38 = vrot.slane %v155_v37, %v159_v36 }
 0x143   :  { %299 = vmatprep.mubr.bf16.mxu1 %v585_v48  ;;  %v116_v29 = vmul.f32 %v464_v6, %v103_v26  ;;  %v714_v39 = vrot.slane %v155_v37, %v163_v32 }
 0x144   :  { %v130_v30 = vpack.c.bf16 %v125_v28, %v124_v27 }
 0x145   :  { %v129_v34 = vadd.f32 %v465_v12, %v116_v29 }
 0x146   :  { %280 = vmatmul.mubr.bf16.vlgmr.msra.gmra.mrb[0].mxu0 %v130_v30 }
 0x147   :  { %v132_v31 = vpack.c.bf16 %v129_v34, %v128_v33 }
 0x14a   :  { %300 = vmatmul.mubr.bf16.gmra.mrb[4].mxu1 %v132_v31 }
 0x215   :  { %v291_v40 = vpop.f32.mrb[0].mxu1 }
 0x216   :  { %v717_v41 = vadd.f32 %v291_v40, %v712_v38  ;;  %v293_v42 = vpop.f32.mrb[1].mxu1 }
 0x217   :  { %v720_v43 = vadd.f32 %v293_v42, %v714_v39  ;;  %v295_v44 = vpop.f32.mrb[2].mxu1 }
 0x218   :  { %v314_v45 = vmul.f32 %v717_v41, %v717_v41  ;;  %v725_v46 = vadd.f32 %v295_v44, %v712_v38  ;;  %v297_v47 = vpop.f32.mrb[3].mxu1 }
 0x219   :  { %v315_v48 = vmul.f32 %v720_v43, %v720_v43  ;;  %v730_v49 = vadd.f32 %v297_v47, %v714_v39  ;;  %v281_v50 = vpop.f32.mrb[0].mxu0 }
 0x21a   :  { %v326_v51 = vmul.f32 %v314_v45, %v717_v41  ;;  %v316_v52 = vmul.f32 %v725_v46, %v725_v46  ;;  %v736_v53 = vadd.f32 %v281_v50, %v712_v38  ;;  %v283_v54 = vpop.f32.mrb[1].mxu0 }
 0x21b   :  { %v327_v55 = vmul.f32 %v315_v48, %v720_v43  ;;  %v317_v56 = vmul.f32 %v730_v49, %v730_v49  ;;  %v742_v57 = vadd.f32 %v283_v54, %v714_v39  ;;  %v285_v58 = vpop.f32.mrb[2].mxu0 }
 0x21c   :  { %v338_v59 = vmul.f32 0.044715, %v326_v51  ;;  %v328_v60 = vmul.f32 %v316_v52, %v725_v46  ;;  %v310_v61 = vmul.f32 %v736_v53, %v736_v53  ;;  %v748_v62 = vadd.f32 %v285_v58, %v712_v38  ;;  %v287_v63 = vpop.f32.mrb[3].mxu0 }
 0x21d   :  { %v339_v0 = vmul.f32 0.044715, %v327_v55  ;;  %v329_v1 = vmul.f32 %v317_v56, %v730_v49  ;;  %v311_v2 = vmul.f32 %v742_v57, %v742_v57  ;;  %v754_v3 = vadd.f32 %v287_v63, %v714_v39  ;;  %v301_v4 = vpop.f32.mrb[4].mxu1 }
 0x21e   :  { %v350_v5 = vadd.f32 %v338_v59, %v717_v41  ;;  %v340_v6 = vmul.f32 0.044715, %v328_v60  ;;  %v322_v7 = vmul.f32 %v310_v61, %v736_v53  ;;  %v312_v8 = vmul.f32 %v748_v62, %v748_v62  ;;  %v303_v9 = vpop.f32.mrb[5].mxu1 }
 0x21f   :  { %v351_v10 = vadd.f32 %v339_v0, %v720_v43  ;;  %v341_v11 = vmul.f32 0.044715, %v329_v1  ;;  %v323_v12 = vmul.f32 %v311_v2, %v742_v57  ;;  %v313_v13 = vmul.f32 %v754_v3, %v754_v3  ;;  %v305_v14 = vpop.f32.mrb[6].mxu1 }
 0x220   :  { %v362_v15 = vmul.f32 0.7978846, %v350_v5  ;;  %v352_v16 = vadd.f32 %v340_v6, %v725_v46  ;;  %v334_v18 = vmul.f32 0.044715, %v322_v7  ;;  %v324_v19 = vmul.f32 %v312_v8, %v748_v62  ;;  %v307_v20 = vpop.f32.mrb[7].mxu1 }
 0x221   :  { %v363_v21 = vmul.f32 0.7978846, %v351_v10  ;;  %v353_v22 = vadd.f32 %v341_v11, %v730_v49  ;;  %v335_v25 = vmul.f32 0.044715, %v323_v12  ;;  %v325_v23 = vmul.f32 %v313_v13, %v754_v3 }
 0x222   :  { %561 = vtanh.f32 %v362_v15  ;;  %v364_v26 = vmul.f32 0.7978846, %v352_v16  ;;  %v346_v17 = vadd.f32 %v334_v18, %v736_v53  ;;  %v336_v27 = vmul.f32 0.044715, %v324_v19 }
 0x223   :  { %563 = vtanh.f32 %v363_v21  ;;  %v365_v28 = vmul.f32 0.7978846, %v353_v22  ;;  %v347_v29 = vadd.f32 %v335_v25, %v742_v57  ;;  %v337_v30 = vmul.f32 0.044715, %v325_v23 }
 0x224   :  { %565 = vtanh.f32 %v364_v26  ;;  %v358_v33 = vmul.f32 0.7978846, %v346_v17  ;;  %v348_v34 = vadd.f32 %v336_v27, %v748_v62  ;;  %v772_v31 = vadd.f32 %v301_v4, %v712_v38 }
 0x225   :  { %567 = vtanh.f32 %v365_v28  ;;  %v359_v35 = vmul.f32 0.7978846, %v347_v29  ;;  %v349_v24 = vadd.f32 %v337_v30, %v754_v3  ;;  %v776_v36 = vadd.f32 %v303_v9, %v714_v39 }
 0x226   :  { %569 = vtanh.f32 %v358_v33  ;;  %v360_v37 = vmul.f32 0.7978846, %v348_v34  ;;  %v318_v32 = vmul.f32 %v772_v31, %v772_v31  ;;  %v781_v40 = vadd.f32 %v305_v14, %v712_v38 }
 0x227   :  { %571 = vtanh.f32 %v359_v35  ;;  %v361_v42 = vmul.f32 0.7978846, %v349_v24  ;;  %v319_v44 = vmul.f32 %v776_v36, %v776_v36  ;;  %v786_v45 = vadd.f32 %v307_v20, %v714_v39 }
 0x228   :  { %573 = vtanh.f32 %v360_v37  ;;  %v330_v47 = vmul.f32 %v318_v32, %v772_v31  ;;  %v320_v48 = vmul.f32 %v781_v40, %v781_v40 }
 0x229   :  { %575 = vtanh.f32 %v361_v42  ;;  %v331_v50 = vmul.f32 %v319_v44, %v776_v36  ;;  %v321_v38 = vmul.f32 %v786_v45, %v786_v45 }
 0x22a   :  { %v342_v51 = vmul.f32 0.044715, %v330_v47  ;;  %v332_v52 = vmul.f32 %v320_v48, %v781_v40 }
 0x22b   :  { %v343_v54 = vmul.f32 0.044715, %v331_v50  ;;  %v333_v55 = vmul.f32 %v321_v38, %v786_v45 }
 0x22c   :  { %v562_v39 = vpop.eup %561  ;;  %v354_v56 = vadd.f32 %v342_v51, %v772_v31  ;;  %v344_v58 = vmul.f32 0.044715, %v332_v52 }
 0x22d   :  { %v564_v59 = vpop.eup %563  ;;  %v386_v60 = vadd.f32 1.0, %v562_v39  ;;  %v355_v61 = vadd.f32 %v343_v54, %v776_v36  ;;  %v345_v63 = vmul.f32 0.044715, %v333_v55 }
 0x22e   :  { %v566_v0 = vpop.eup %565  ;;  %v387_v1 = vadd.f32 1.0, %v564_v59  ;;  %v366_v2 = vmul.f32 0.7978846, %v354_v56  ;;  %v356_v4 = vadd.f32 %v344_v58, %v781_v40 }
 0x22f   :  { %v568_v5 = vpop.eup %567  ;;  %v398_v6 = vmul.f32 0.5, %v386_v60  ;;  %v388_v7 = vadd.f32 1.0, %v566_v0  ;;  %v367_v8 = vmul.f32 0.7978846, %v355_v61  ;;  %v357_v9 = vadd.f32 %v345_v63, %v786_v45 }
 0x230   :  { %v570_v10 = vpop.eup %569  ;;  %v399_v11 = vmul.f32 0.5, %v387_v1  ;;  %v389_v12 = vadd.f32 1.0, %v568_v5  ;;  %577 = vtanh.f32 %v366_v2  ;;  %v368_v13 = vmul.f32 0.7978846, %v356_v4 }
 0x231   :  { %v572_v14 = vpop.eup %571  ;;  %v410_v15 = vmul.f32 %v398_v6, %v717_v41  ;;  %v400_v16 = vmul.f32 0.5, %v388_v7  ;;  %v382_v18 = vadd.f32 1.0, %v570_v10  ;;  %579 = vtanh.f32 %v367_v8 }
 0x232   :  { %v574_v19 = vpop.eup %573  ;;  %v411_v20 = vmul.f32 %v399_v11, %v720_v43  ;;  %v401_v21 = vmul.f32 0.5, %v389_v12  ;;  %v383_v22 = vadd.f32 1.0, %v572_v14  ;;  %581 = vtanh.f32 %v368_v13 }
 0x233   :  { %v576_v25 = vpop.eup %575  ;;  %v412_v23 = vmul.f32 %v400_v16, %v725_v46  ;;  %v394_v26 = vmul.f32 0.5, %v382_v18  ;;  %v384_v17 = vadd.f32 1.0, %v574_v19  ;;  %v369_v27 = vmul.f32 0.7978846, %v357_v9 }
 0x234   :  { %v490_v28 = vpack.c.bf16 %v411_v20, %v410_v15  ;;  %v413_v29 = vmul.f32 %v401_v21, %v730_v49  ;;  %v395_v30 = vmul.f32 0.5, %v383_v22  ;;  %v385_v41 = vadd.f32 1.0, %v576_v25 }
 0x235   :  { %v406_v33 = vmul.f32 %v394_v26, %v736_v53  ;;  %v396_v34 = vmul.f32 0.5, %v384_v17  ;;  %583 = vtanh.f32 %v369_v27 }
 0x236   :  { %456 = vst [vmem:[%s835_s5 + $0x10] sm:$0xff] %v490_v28  ;;  %v491_v43 = vpack.c.bf16 %v413_v29, %v412_v23  ;;  %v407_v35 = vmul.f32 %v395_v30, %v742_v57  ;;  %v397_v46 = vmul.f32 0.5, %v385_v41 }
 0x237   :  { %v408_v24 = vmul.f32 %v396_v34, %v748_v62 }
 0x238   :  { %457 = vst [vmem:[%s835_s5 + $0x18] sm:$0xff] %v491_v43  ;;  %v488_v49 = vpack.c.bf16 %v407_v35, %v406_v33  ;;  %v409_v37 = vmul.f32 %v397_v46, %v754_v3 }
 0x23a   :  { %v578_v53 = vpop.eup %577  ;;  %454 = vst [vmem:[%s835_s5] sm:$0xff] %v488_v49  ;;  %v489_v32 = vpack.c.bf16 %v409_v37, %v408_v24 }
 0x23b   :  { %v580_v42 = vpop.eup %579  ;;  %v390_v44 = vadd.f32 1.0, %v578_v53 }
 0x23c   :  { %v582_v47 = vpop.eup %581  ;;  %455 = vst [vmem:[%s835_s5 + $0x8] sm:$0xff] %v489_v32  ;;  %v391_v57 = vadd.f32 1.0, %v580_v42 }
 0x23d   :  { %v402_v62 = vmul.f32 0.5, %v390_v44  ;;  %v392_v48 = vadd.f32 1.0, %v582_v47 }
 0x23e   :  { %v403_v50 = vmul.f32 0.5, %v391_v57 }
 0x23f   :  { %v584_v38 = vpop.eup %583  ;;  %v414_v3 = vmul.f32 %v402_v62, %v772_v31  ;;  %v404_v51 = vmul.f32 0.5, %v392_v48 }
 0x240   :  { %v415_v52 = vmul.f32 %v403_v50, %v776_v36  ;;  %v393_v54 = vadd.f32 1.0, %v584_v38 }
 0x241   :  { %v416_v39 = vmul.f32 %v404_v51, %v781_v40 }
 0x242   :  { %v492_v55 = vpack.c.bf16 %v415_v52, %v414_v3  ;;  %v405_v56 = vmul.f32 0.5, %v393_v54 }
 0x244   :  { %458 = vst [vmem:[%s835_s5 + $0x20] sm:$0xff] %v492_v55  ;;  %v417_v58 = vmul.f32 %v405_v56, %v786_v45 }
 0x246   :  { %v493_v59 = vpack.c.bf16 %v417_v58, %v416_v39 }
 0x248   :  { %459 = vst [vmem:[%s835_s5 + $0x28] sm:$0xff] %v493_v59 }

// kernel: _lambda_.14
= control target key start
LH: loop header
LB: loop body
LE: loop exit
PB: predicated region body
PF: predicated region fallthrough
CT: control target
= control target key end

     0   :  { %s594_s1 = inlined_call_operand.vmem [shape: bf16[256,128], index: 1, kind: input, shape index: {}]   ;;  %s595_s0 = inlined_call_operand.vmem [shape: bf16[48,256], index: 0, kind: input, shape index: {}]   ;;  %s596_s3 = inlined_call_operand.vmem [shape: bf16[48,128], index: 3, kind: input, shape index: {}]   ;;  %s597_s2 = inlined_call_operand.vmem [shape: f32[1,128], index: 2, kind: input, shape index: {}]   ;;  %s598_s4 = inlined_call_operand.vmem [shape: bf16[48,128], index: 4, kind: output, shape index: {}]  }
   0x1   :  { %v457_v0 = vld [vmem:[%s594_s1 + $0x40] sm:$0xff]   ;;  %v459_v2 = vld [vmem:[%s594_s1 + $0x48] sm:$0xff]   ;;  %v461_v4 = vld [vmem:[%s594_s1 + $0x50] sm:$0xff]  }
   0x2   :  { %v458_v1 = vld [vmem:[%s594_s1] sm:$0xff]   ;;  %441 = vmatprep.subr.bf16.mxu1 %v457_v0  ;;  %407 = vmatprep.subr.bf16.mxu0 %v457_v0  ;;  %v460_v3 = vld [vmem:[%s594_s1 + $0x8] sm:$0xff]   ;;  %v462_v5 = vld [vmem:[%s594_s1 + $0x10] sm:$0xff]  }
   0x3   :  { %449 = vmatpush3.bf16.msra.mxu1 %v458_v1  ;;  %408 = vmatpush3.bf16.msra.mxu0 %v458_v1  ;;  %v463_v6 = vld [vmem:[%s594_s1 + $0x58] sm:$0xff]   ;;  %v465_v8 = vld [vmem:[%s594_s1 + $0x60] sm:$0xff]   ;;  %v467_v10 = vld [vmem:[%s594_s1 + $0x68] sm:$0xff]  }
   0x4   :  { %442 = vmatprep.subr.bf16.mxu1 %v459_v2  ;;  %409 = vmatprep.subr.bf16.mxu0 %v459_v2  ;;  %v464_v7 = vld [vmem:[%s594_s1 + $0x18] sm:$0xff]   ;;  %v466_v9 = vld [vmem:[%s594_s1 + $0x20] sm:$0xff]   ;;  %v468_v13 = vld [vmem:[%s594_s1 + $0x28] sm:$0xff]  }
   0x5   :  { %v475_v11 = vld [vmem:[%s595_s0 + $0x14] ss:$8 sps:$4 sm:$0xff]   ;;  %v478_v12 = vld [vmem:[%s595_s0 + $0x4] ss:$8 sps:$4 sm:$0xff]   ;;  %v473_v18 = vld [vmem:[%s595_s0 + $0x10] ss:$8 sps:$4 sm:$0xff]  }
   0x6   :  { %v469_v14 = vld [vmem:[%s594_s1 + $0x70] sm:$0xff]   ;;  %238 = vmatprep.mubr.bf16.mxu1 %v475_v11  ;;  %230 = vmatprep.mubr.bf16.mxu0 %v478_v12  ;;  %v471_v16 = vld [vmem:[%s594_s1 + $0x78] sm:$0xff]   ;;  %v476_v19 = vld [vmem:[%s595_s0] ss:$8 sps:$4 sm:$0xff]  }
   0x7   :  { %450 = vmatpush3.bf16.msra.mxu1 %v460_v3  ;;  %410 = vmatpush3.bf16.msra.mxu0 %v460_v3  ;;  %v470_v15 = vld [vmem:[%s594_s1 + $0x30] sm:$0xff]   ;;  %v472_v17 = vld [vmem:[%s594_s1 + $0x38] sm:$0xff]   ;;  %v479_v20 = vld [vmem:[%s595_s0 + $0x24] ss:$8 sps:$4 sm:$0xff]  }
   0x8   :  { %443 = vmatprep.subr.bf16.mxu1 %v461_v4  ;;  %411 = vmatprep.subr.bf16.mxu0 %v461_v4  ;;  %v481_v21 = vld [vmem:[%s595_s0 + $0x20] ss:$8 sps:$4 sm:$0xff]   ;;  %v404_v51 = vld [vmem:[%s596_s3 + $0x10] sm:$0xff]  }
   0x9   :  { %v377_v22 = vld [vmem:[%s596_s3] sm:$0xff]   ;;  %v403_v24 = vld [vmem:[%s596_s3 + $0x8] sm:$0xff]   ;;  %v386_v58 = vunpack.c.l.bf16 %v404_v51  ;;  %v387_v60 = vunpack.c.h.bf16 %v404_v51 }
   0xa   :  { %v363_v27 = vld [vmem:[%s597_s2] ss:$0 sm:$0xff]  ;;  %v378_v32 = vunpack.c.l.bf16 %v377_v22  ;;  %v382_v34 = vunpack.c.l.bf16 %v403_v24  ;;  %v383_v36 = vunpack.c.h.bf16 %v403_v24  ;;  %v379_v38 = vunpack.c.h.bf16 %v377_v22 }
   0xb   :  { %451 = vmatpush3.bf16.msra.mxu1 %v462_v5  ;;  %412 = vmatpush3.bf16.msra.mxu0 %v462_v5 }
   0xc   :  { %444 = vmatprep.subr.bf16.mxu1 %v463_v6  ;;  %413 = vmatprep.subr.bf16.mxu0 %v463_v6 }
   0xf   :  { %452 = vmatpush3.bf16.msra.mxu1 %v464_v7  ;;  %414 = vmatpush3.bf16.msra.mxu0 %v464_v7 }
  0x10   :  { %445 = vmatprep.subr.bf16.mxu1 %v465_v8  ;;  %415 = vmatprep.subr.bf16.mxu0 %v465_v8 }
  0x13   :  { %453 = vmatpush3.bf16.msra.mxu1 %v466_v9  ;;  %416 = vmatpush3.bf16.msra.mxu0 %v466_v9 }
  0x14   :  { %446 = vmatprep.subr.bf16.mxu1 %v467_v10  ;;  %417 = vmatprep.subr.bf16.mxu0 %v467_v10 }
  0x17   :  { %454 = vmatpush3.bf16.msra.mxu1 %v468_v13  ;;  %418 = vmatpush3.bf16.msra.mxu0 %v468_v13 }
  0x18   :  { %447 = vmatprep.subr.bf16.mxu1 %v469_v14  ;;  %419 = vmatprep.subr.bf16.mxu0 %v469_v14 }
  0x1b   :  { %455 = vmatpush3.bf16.msra.mxu1 %v470_v15  ;;  %420 = vmatpush3.bf16.msra.mxu0 %v470_v15 }
  0x1c   :  { %448 = vmatprep.subr.bf16.mxu1 %v471_v16  ;;  %421 = vmatprep.subr.bf16.mxu0 %v471_v16 }
  0x1f   :  { %456 = vmatpush3.bf16.msra.mxu1 %v472_v17  ;;  %422 = vmatpush3.bf16.msra.mxu0 %v472_v17 }
  0x22   :  { %239 = vmatmul.mubr.bf16.vlgmr.msra.gmra.mrb[0].mxu1 %v473_v18  ;;  %231 = vmatmul.mubr.bf16.vlgmr.msra.gmra.mrb[0].mxu0 %v476_v19 }
  0x23   :  { %246 = vmatprep.mubr.bf16.mxu1 %v479_v20 }
  0x2a   :  { %247 = vmatmul.mubr.bf16.gmra.mrb[4].mxu1 %v481_v21 }
  0xf5   :  { %v429_v23 = vpop.f32.mrb[0].mxu1  ;;  %v423_v25 = vpop.f32.mrb[0].mxu0 }
  0xf6   :  { %v430_v26 = vpop.f32.mrb[1].mxu1  ;;  %v424_v28 = vpop.f32.mrb[1].mxu0 }
  0xf7   :  { %v431_v29 = vadd.f32 %v430_v26, %v429_v23  ;;  %v432_v30 = vpop.f32.mrb[2].mxu1  ;;  %v425_v31 = vadd.f32 %v424_v28, %v423_v25  ;;  %v426_v33 = vpop.f32.mrb[2].mxu0 }
  0xf8   :  { %v433_v35 = vpop.f32.mrb[3].mxu1  ;;  %v427_v37 = vpop.f32.mrb[3].mxu0 }
  0xf9   :  { %v285_v39 = vadd.f32 %v431_v29, %v363_v27  ;;  %v434_v40 = vadd.f32 %v433_v35, %v432_v30  ;;  %v283_v41 = vadd.f32 %v425_v31, %v363_v27  ;;  %v428_v42 = vadd.f32 %v427_v37, %v426_v33 }
  0xfb   :  { %v286_v43 = vadd.f32 %v434_v40, %v363_v27  ;;  %v301_v44 = vadd.f32 %v378_v32, %v283_v41  ;;  %v284_v45 = vadd.f32 %v428_v42, %v363_v27  ;;  %v303_v46 = vadd.f32 %v382_v34, %v285_v39 }
  0xfd   :  { %v304_v47 = vadd.f32 %v383_v36, %v286_v43  ;;  %v302_v48 = vadd.f32 %v379_v38, %v284_v45  ;;  %v435_v49 = vpop.f32.mrb[4].mxu1 }
  0xfe   :  { %v436_v50 = vpop.f32.mrb[5].mxu1 }
  0xff   :  { %v396_v52 = vpack.c.bf16 %v304_v47, %v303_v46  ;;  %v391_v53 = vpack.c.bf16 %v302_v48, %v301_v44  ;;  %v437_v54 = vadd.f32 %v436_v50, %v435_v49  ;;  %v438_v55 = vpop.f32.mrb[6].mxu1 }
 0x100   :  { %v439_v56 = vpop.f32.mrb[7].mxu1 }
 0x101   :  { %405 = vst [vmem:[%s598_s4 + $0x8] sm:$0xff] %v396_v52   ;;  %392 = vst [vmem:[%s598_s4] sm:$0xff] %v391_v53   ;;  %v287_v57 = vadd.f32 %v437_v54, %v363_v27  ;;  %v440_v59 = vadd.f32 %v439_v56, %v438_v55 }
 0x103   :  { %v288_v61 = vadd.f32 %v440_v59, %v363_v27  ;;  %v305_v62 = vadd.f32 %v386_v58, %v287_v57 }
 0x105   :  { %v306_v63 = vadd.f32 %v387_v60, %v288_v61 }
 0x107   :  { %v401_v0 = vpack.c.bf16 %v306_v63, %v305_v62 }
 0x109   :  { %406 = vst [vmem:[%s598_s4 + $0x10] sm:$0xff] %v401_v0  }

// kernel: _lambda_.19
= control target key start
LH: loop header
LB: loop body
LE: loop exit
PB: predicated region body
PF: predicated region fallthrough
CT: control target
= control target key end

     0   :  { %vm17_vm0 = vcmask 1041408   ;;  %s134_s0 = inlined_call_operand.vmem [shape: bf16[2,128], index: 0, kind: input, shape index: {}]   ;;  %s135_s1 = inlined_call_operand.vmem [shape: f32[1,128], index: 1, kind: input, shape index: {}]   ;;  %s136_s2 = inlined_call_operand.vmem [shape: f32[1,128], index: 2, kind: input, shape index: {}]   ;;  %s137_s3 = inlined_call_operand.hbm [shape: f32[2,128], index: 3, kind: output, shape index: {}]  }
   0x1   :  { %v15_v0 = vld [vmem:[%s134_s0] sm:$0x1] }
   0x2   :  { %8 = vsyncpa [#allocation3], 0  ;;  %v16_v1 = vunpack.c.l.bf16 %v15_v0  ;;  %v63_v12 = vld [vmem:[%s135_s1] ss:$0 sm:$0xff]  ;;  %s92_s17 = smov [#allocation2]  }
   0x3   :  { %v64_v14 = vld [vmem:[%s136_s2] ss:$0 sm:$0xff]  ;;  %s55_s18 = sshll.u32 %s92_s17, 4  ;;  %s56_s18 = int_to_ptr.vmem [resolvable:$true] %s55_s18 }
   0x4   :  { %v18_v2 = vsel %vm17_vm0, %v16_v1, 0.0  ;;  %s68_s19 = scalar_lea.vmem %s56_s18, 32  ;;  %p73_p1 = scmp.lt.s32.totalorder %s56_s18, %s56_s18 }
   0x5   :  { %19 = vadd.xlane.f32.xlu0 %v18_v2  ;;  %p69_p0 = scmp.ne.s32.totalorder %s56_s18, %s68_s19  ;;  %p74_p2 = scmp.lt.s32.totalorder %s68_s19, %s68_s19 }
   0x7   :  { %p75_p3 = por %p74_p2, %p73_p1 }
   0x9   :  { %p76_p4 = pnand %p75_p3, %p69_p0 }
  0x92   :  { %v20_v3 = vpop.xlane.xlu0 %19 }
  0x93   :  { %v22_v4 = vmul.f32 0.0078125, %v20_v3 }
  0x95   :  { %v23_v5 = vsub.f32 %v16_v1, %v22_v4 }
  0x97   :  { %v24_v6 = vmul.f32 %v23_v5, %v23_v5 }
  0x99   :  { %v25_v7 = vsel %vm17_vm0, %v24_v6, 0.0 }
  0x9a   :  { %26 = vadd.xlane.f32.xlu0 %v25_v7 }
 0x127   :  { %v27_v8 = vpop.xlane.xlu0 %26 }
 0x128   :  { %v28_v9 = vmul.f32 0.0078125, %v27_v8 }
 0x12a   :  { %v29_v10 = vadd.f32 1e-06, %v28_v9 }
 0x12c   :  { %66 = vrsqrt.f32 %v29_v10 }
 0x136   :  { %v67_v11 = vpop.eup %66 }
 0x137   :  { %v31_v13 = vmul.f32 %v67_v11, %v23_v5 }
 0x139   :  { %v39_v15 = vmul.f32 %v63_v12, %v31_v13 }
 0x13b   :  { %v47_v16 = vadd.f32 %v64_v14, %v39_v15 }
 0x13d   :  { %48 = vst [vmem:[#allocation2] sm:$0x3] %v47_v16 }
 0x13e   :  { %79 = shalt.err (!%p76_p4)
}
 0x13f   :  { %s80_s21 = scalar_lea.hbm %s137_s3, 32 }
 0x140   :  { %p81_p5 = scmp.ne.s32.totalorder %s137_s3, %s80_s21  ;;  %p84_p6 = scmp.lt.u32.totalorder %s80_s21, %s137_s3 }
 0x142   :  { %p86_p7 = pnand %p84_p6, %p81_p5 }
 0x144   :  { %89 = shalt.err (!%p86_p7)
}
 0x145   :  { %58 = dma.vmem_to_hbm [thread:$0]  %s56_s18, 32, %s137_s3, [#allocation3]  }
 0x146   :  { %90 = dma.done.wait [#allocation3], 32  }
 0x147   :  { %91 = vsyncadd [#allocation3], 4294967264 }
 0x148   :  { %62 = vsyncpa [#allocation3], 1 }

</bundles_post_ra>
